<compile_context>
chip_gen: v7x
topology: tpu7x:2x2x1
jax: 0.10.0
libtpu: 0.0.40
codegen_flags: <defaults>
</compile_context>

<pallas_src>
import jax
import jax.numpy as jnp
from jax import lax
from jax.experimental import pallas as pl
from jax.experimental.pallas import tpu as pltpu


def _pick_ck(bt, ti, n, h, target_rows=256, max_bytes=4 << 20):
  """Chunk of the reduced i-axis processed per inner step: aim for >=256 MXU rows,
  prefer sublane-aligned (multiple-of-8) chunks, keep the [bt,ck,n,h] intermediate small."""
  cap = max(1, max_bytes // (4 * bt * n * h))
  divs = [c for c in range(1, ti + 1) if ti % c == 0]
  for c in divs:                              # aligned chunks hitting the MXU-row target
    if c % 8 == 0 and bt * c * n >= target_rows and c <= cap:
      return c
  for c in divs:                              # any chunk hitting the target
    if bt * c * n >= target_rows and c <= cap:
      return c
  allowed = [c for c in divs if c <= cap]
  return allowed[-1] if allowed else 1


def _baseline_step_kernel(
    node_ref, edge_ref, graph_ref, maskb_ref, hid_ref,
    wn_ref, bn_ref, wem_ref, wgm_ref, mbias_ref,
    wzn_ref, wzh_ref, o2_ref, wdnew_ref, bd_ref,
    dec_ref, newh_ref,
    msg1_s, msg2_s, o1p_s, acc_s,
):
  f32 = jnp.float32
  bt, ti, n, fe = edge_ref.shape
  fn = node_ref.shape[-1]
  fg = graph_ref.shape[-1]
  h = hid_ref.shape[-1]
  d = dec_ref.shape[-1]

  it = pl.program_id(1)
  last = pl.num_programs(1) - 1

  # --- first i-step: node encoder + fused z/decoder matmul, init running max -------------
  @pl.when(it == 0)
  def _init():
    node = node_ref[...].reshape(bt * n, fn)
    hidden = hid_ref[...].reshape(bt * n, h)
    node_enc = jnp.dot(node, wn_ref[...], preferred_element_type=f32) + bn_ref[...]
    # columns of zw = [msg1 | msg2 | o1 | dec_partial]; rows split node_enc / hidden.
    zw = (jnp.dot(node_enc, wzn_ref[...], preferred_element_type=f32)
          + jnp.dot(hidden, wzh_ref[...], preferred_element_type=f32))    # [bt*n, 3h+d]
    msg1_s[...] = zw[:, :h].reshape(bt, n, h)
    msg2_s[...] = zw[:, h:2 * h].reshape(bt, n, h)
    o1p_s[...] = zw[:, 2 * h:3 * h].reshape(bt, n, h)
    # dec output block is grid-resident across the i axis -> partial result persists.
    dec_ref[...] = (zw[:, 3 * h:] + bd_ref[...]).reshape(bt, n, d)
    acc_s[...] = jnp.full(acc_s.shape, -1e9, dtype=f32)

  # --- every i-step: chunked edge messages, additive-mask running max ---------------------
  w_em = wem_ref[...]                                   # [fe, h]  (= W_edge @ Me)
  ck = _pick_ck(bt, ti, n, h)
  nchunks = ti // ck
  row0 = pl.multiple_of(it * ti, ti)

  def _chunk(start):
    off = pl.multiple_of(row0 + start, ck)
    e = edge_ref[:, pl.ds(start, ck), :, :]             # [bt, ck, n, fe]
    mb = maskb_ref[:, pl.ds(start, ck), :]              # [bt, ck, n]   (0 or -1e9)
    m2 = msg2_s[:, pl.ds(off, ck), :]                   # [bt, ck, h]
    # Fe contraction on the otherwise-idle MXU (i-loop is VALU-bound).
    em = jnp.dot(e.reshape(bt * ck * n, fe), w_em,
                 preferred_element_type=f32).reshape(bt, ck, n, h)
    work = em + m2[:, :, None, :] + mb[..., None]       # [bt, ck, n, h] (small, ck rows)
    upd = work[:, 0] if ck == 1 else jnp.max(work, axis=1)
    acc_s[...] = jnp.maximum(acc_s[...], upd)

  if nchunks <= 8:
    for c in range(nchunks):
      _chunk(c * ck)
  else:
    def _body(c, carry):
      _chunk(c * ck)
      return carry
    lax.fori_loop(0, nchunks, _body, 0)

  # --- last i-step: add i-independent column terms, readout, finish decoder ---------------
  @pl.when(it == last)
  def _finalize():
    graph = graph_ref[...].reshape(bt, fg)
    msg_g = jnp.dot(graph, wgm_ref[...], preferred_element_type=f32)        # [bt, h]
    # i-independent column terms (self-loops guarantee the -1e9 sentinel never wins).
    agg = (acc_s[...] + msg1_s[...] + msg_g[:, None, :]
           + mbias_ref[...]).reshape(bt * n, h)
    h_new = jnp.maximum(
        o1p_s[...].reshape(bt * n, h)
        + jnp.dot(agg, o2_ref[...], preferred_element_type=f32), 0.0)       # [bt*n, h]
    dec_ref[...] = dec_ref[...] + jnp.dot(
        h_new, wdnew_ref[...], preferred_element_type=f32).reshape(bt, n, d)
    newh_ref[...] = h_new.reshape(bt, n, h)


def _vmem_capacity_bytes():
  try:
    return int(pltpu.get_tpu_info().vmem_capacity_bytes)
  except Exception:
    return 128 * 1024 * 1024


def _fixed_bytes(bt, n, h, fn, d):
  # persistent scratches + double-buffered node/hidden inputs and dec/newh outputs (f32)
  return 4 * bt * n * (4 * h + 2 * (fn + h) + 2 * (d + h))


def _pick_block_b(batch, n, h, fn, d, two_tc, budget_bytes):
  """Batch elements per grid step. v7x (2 TCs): force >=2 steps on the parallel axis.
  v5e/v6e (1 TC): largest bt whose fixed footprint stays within ~half the budget."""
  divisors = sorted(q for q in range(1, batch + 1) if batch % q == 0)
  if two_tc and batch >= 2:
    divisors = [q for q in divisors if batch // q >= 2]
  best = divisors[0]
  for q in divisors:
    if _fixed_bytes(q, n, h, fn, d) <= budget_bytes // 2:
      best = q
  return best


def _pick_ti(bt, n, fe, h, fn, d, budget_bytes):
  """Tile of the reduced (source-node) axis. Only the double-buffered edge + mask tiles
  scale with ti now (no [bt,ti,n,h] intermediate), so ti can usually be N."""
  per_i = 2 * 4 * bt * n * (fe + 1)                      # edge + mask rows, x2 buffers, f32
  fixed = _fixed_bytes(bt, n, h, fn, d)
  cands = [t for t in range(n, 0, -1) if n % t == 0 and (t == n or t % 8 == 0)]
  for t in cands:
    if fixed + t * per_i <= budget_bytes:
      return t
  return cands[-1]


def baseline_forward(node_fts, edge_fts, graph_fts, adj, hidden, params):
  """One encode/process/decode step of BaselineModel via a Pallas TPU kernel."""
  f32 = jnp.float32
  B, N, Fn = node_fts.shape
  Fe = edge_fts.shape[-1]
  Fg = graph_fts.shape[-1]
  H = hidden.shape[-1]
  out_dim = params['Wd_out'].shape[-1]
  hint_dim = params['Wd_hint'].shape[-1]
  D = out_dim + hint_dim

  p = params
  # ---- fold / fuse parameters once in the wrapper (tiny ops, outside the hot loop) -------
  W_node = p['W_node'].astype(f32)
  b_node = p['b_node'].astype(f32)
  W_em = (p['W_edge'] @ p['Me']).astype(f32)                       # edge encoder folded
  W_gm = (p['W_graph'] @ p['Mg']).astype(f32)                      # graph encoder folded
  msg_bias = (p['M1_b'] + p['M2_b'] + p['Me_b'] + p['Mg_b']
              + p['b_edge'] @ p['Me'] + p['b_graph'] @ p['Mg']).astype(f32)   # [1, H]
  # decoder weights fused column-wise: [out | hint]
  Wd = jnp.concatenate([p['Wd_out'], p['Wd_hint']], axis=1).astype(f32)       # [3H, D]
  bd = jnp.concatenate([p['bd_out'], p['bd_hint']], axis=1).astype(f32)       # [1, D]
  # z-side weights: columns [msg1 | msg2 | o1 | dec_partial], rows split node_enc / hidden.
  W_z_node = jnp.concatenate(
      [p['M1'][:H], p['M2'][:H], p['O1'][:H], Wd[:H]], axis=1).astype(f32)    # [H, 3H+D]
  W_z_hid = jnp.concatenate(
      [p['M1'][H:], p['M2'][H:], p['O1'][H:], Wd[H:2 * H]], axis=1).astype(f32)
  O2 = p['O2'].astype(f32)
  Wd_new = Wd[2 * H:]                                                         # [H, D]

  param_arrays = [W_node, b_node, W_em, W_gm, msg_bias,
                  W_z_node, W_z_hid, O2, Wd_new, bd]

  # additive mask: 0 where connected, -1e9 where not (replaces vcmp+vsel in the hot loop)
  mask_bias = jnp.where(adj > 0.0, 0.0, -1e9).astype(f32)          # [B, N, N]

  # ---- generation-aware budgets ----------------------------------------------------------
  vmem_cap = _vmem_capacity_bytes()
  two_tc = vmem_cap <= 96 * 1024 * 1024           # v7x-like: 64 MiB per TC, 2 TCs/chip
  vmem_limit = (vmem_cap * 3) // 4                # ~48 MiB on v7x, ~96 MiB on v5e/v6e
  tile_budget = (vmem_cap * 3) // 8               # ~24 MiB on v7x, ~48 MiB on v5e/v6e

  bt = _pick_block_b(B, N, H, Fn, D, two_tc, tile_budget)
  ti = _pick_ti(bt, N, Fe, H, Fn, D, tile_budget)
  grid = (B // bt, N // ti)                       # reduction (i) axis last

  def param_spec(arr):
    return pl.BlockSpec(arr.shape, lambda b, i: (0, 0))

  in_specs = [
      pl.BlockSpec((bt, N, Fn), lambda b, i: (b, 0, 0)),
      pl.BlockSpec((bt, ti, N, Fe), lambda b, i: (b, i, 0, 0)),
      pl.BlockSpec((bt, 1, Fg), lambda b, i: (b, 0, 0)),
      pl.BlockSpec((bt, ti, N), lambda b, i: (b, i, 0)),
      pl.BlockSpec((bt, N, H), lambda b, i: (b, 0, 0)),
  ] + [param_spec(q) for q in param_arrays]

  out_specs = [
      pl.BlockSpec((bt, N, D), lambda b, i: (b, 0, 0)),
      pl.BlockSpec((bt, N, H), lambda b, i: (b, 0, 0)),
  ]
  out_shape = (
      jax.ShapeDtypeStruct((B, N, D), f32),
      jax.ShapeDtypeStruct((B, N, H), f32),
  )
  scratch_shapes = [pltpu.VMEM((bt, N, H), f32) for _ in range(4)]

  dec, new_hidden = pl.pallas_call(
      _baseline_step_kernel,
      out_shape=out_shape,
      grid_spec=pltpu.PrefetchScalarGridSpec(
          num_scalar_prefetch=0,
          grid=grid,
          in_specs=in_specs,
          out_specs=out_specs,
          scratch_shapes=scratch_shapes,
      ),
      compiler_params=pltpu.CompilerParams(
          dimension_semantics=('parallel', 'arbitrary'),
          vmem_limit_bytes=int(vmem_limit),
      ),
  )(node_fts.astype(f32), edge_fts.astype(f32), graph_fts.astype(f32),
    mask_bias, hidden.astype(f32), *param_arrays)

  return dec[..., :out_dim], dec[..., out_dim:], new_hidden


def baseline_forward_ref(node_fts, edge_fts, graph_fts, adj, hidden, p):
  """Pure-JAX reference implementation (same math, original parameterization)."""
  node_enc = node_fts @ p['W_node'] + p['b_node']
  edge_enc = jnp.einsum('bijf,fh->bijh', edge_fts, p['W_edge']) + p['b_edge']
  graph_enc = graph_fts @ p['W_graph'] + p['b_graph']        # [B,1,H]

  z = jnp.concatenate([node_enc, hidden], axis=-1)           # [B,N,2H]
  msg1 = z @ p['M1'] + p['M1_b']
  msg2 = z @ p['M2'] + p['M2_b']
  msg_e = jnp.einsum('bijh,hk->bijk', edge_enc, p['Me']) + p['Me_b']
  msg_g = graph_enc @ p['Mg'] + p['Mg_b']                    # [B,1,H]

  msgs = (msg1[:, None, :, :] + msg2[:, :, None, :] + msg_e
          + msg_g[:, None, :, :])
  masked = jnp.where(adj[..., None] > 0.0, msgs, -1e9)
  agg = jnp.max(masked, axis=1)
  h_new = jax.nn.relu(z @ p['O1'] + agg @ p['O2'])

  h_t = jnp.concatenate([node_enc, hidden, h_new], axis=-1)
  out_pred = h_t @ p['Wd_out'] + p['bd_out']
  hint_pred = h_t @ p['Wd_hint'] + p['bd_hint']
  return out_pred, hint_pred, h_new


def init_params(key, Fn, Fe, Fg, H, out_dim, hint_dim):
  ks = jax.random.split(key, 20)
  s = 0.1
  n = jax.random.normal
  return {
      'W_node': s * n(ks[0], (Fn, H), jnp.float32),
      'b_node': s * n(ks[1], (1, H), jnp.float32),
      'W_edge': s * n(ks[2], (Fe, H), jnp.float32),
      'b_edge': s * n(ks[3], (1, H), jnp.float32),
      'W_graph': s * n(ks[4], (Fg, H), jnp.float32),
      'b_graph': s * n(ks[5], (1, H), jnp.float32),
      'M1': s * n(ks[6], (2 * H, H), jnp.float32),
      'M1_b': s * n(ks[7], (1, H), jnp.float32),
      'M2': s * n(ks[8], (2 * H, H), jnp.float32),
      'M2_b': s * n(ks[9], (1, H), jnp.float32),
      'Me': s * n(ks[10], (H, H), jnp.float32),
      'Me_b': s * n(ks[11], (1, H), jnp.float32),
      'Mg': s * n(ks[12], (H, H), jnp.float32),
      'Mg_b': s * n(ks[13], (1, H), jnp.float32),
      'O1': s * n(ks[14], (2 * H, H), jnp.float32),
      'O2': s * n(ks[15], (H, H), jnp.float32),
      'Wd_out': s * n(ks[16], (3 * H, out_dim), jnp.float32),
      'bd_out': s * n(ks[17], (1, out_dim), jnp.float32),
      'Wd_hint': s * n(ks[18], (3 * H, hint_dim), jnp.float32),
      'bd_hint': s * n(ks[19], (1, hint_dim), jnp.float32),
  }


if __name__ == '__main__':
  B, N = 2, 8                     # batch, number of nodes
  Fn, Fe, Fg = 4, 4, 4            # raw input / hint feature dims
  H = 32                          # hidden_dim
  out_dim, hint_dim = 8, 8        # output / hint prediction dims

  key = jax.random.PRNGKey(0)
  k_node, k_edge, k_graph, k_adj, k_hid, k_par = jax.random.split(key, 6)

  node_fts = jax.random.normal(k_node, (B, N, Fn), jnp.float32)
  edge_fts = jax.random.normal(k_edge, (B, N, N, Fe), jnp.float32)
  graph_fts = jax.random.normal(k_graph, (B, 1, Fg), jnp.float32)
  # adjacency with self-loops (as CLRS always has; required by the masked-max hoisting)
  adj = (jax.random.uniform(k_adj, (B, N, N)) > 0.5).astype(jnp.float32)
  adj = jnp.maximum(adj, jnp.eye(N, dtype=jnp.float32)[None])
  hidden = jax.random.normal(k_hid, (B, N, H), jnp.float32)

  params = init_params(k_par, Fn, Fe, Fg, H, out_dim, hint_dim)

  # TODO(synk): full CLRS machinery (per-hint time loop, LSTM gating, soft/hard hint
  # re-encoding, per-type decoders) is orchestration around this step and is not
  # re-implemented here; this kernel covers one encode/process/decode step.

  out_pred, hint_pred, h_new = jax.block_until_ready(
      baseline_forward(node_fts, edge_fts, graph_fts, adj, hidden, params))

  out_ref, hint_ref, h_ref = baseline_forward_ref(
      node_fts, edge_fts, graph_fts, adj, hidden, params)

  assert jnp.allclose(out_pred, out_ref, atol=1e-4, rtol=1e-4)
  assert jnp.allclose(hint_pred, hint_ref, atol=1e-4, rtol=1e-4)
  assert jnp.allclose(h_new, h_ref, atol=1e-4, rtol=1e-4)

  print("KERNEL_OK")
</pallas_src>

<mosaic_0001>
module attributes {stable_mosaic.version = 11 : i64} {
  func.func @_baseline_step_kernel(%arg0: i32, %arg1: i32, %arg2: memref<2x8x4xf32, #tpu.memory_space<vmem>>, %arg3: memref<2x8x8x4xf32, #tpu.memory_space<vmem>>, %arg4: memref<2x1x4xf32, #tpu.memory_space<vmem>>, %arg5: memref<2x8x8xf32, #tpu.memory_space<vmem>>, %arg6: memref<2x8x32xf32, #tpu.memory_space<vmem>>, %arg7: memref<4x32xf32, #tpu.memory_space<vmem>>, %arg8: memref<1x32xf32, #tpu.memory_space<vmem>>, %arg9: memref<4x32xf32, #tpu.memory_space<vmem>>, %arg10: memref<4x32xf32, #tpu.memory_space<vmem>>, %arg11: memref<1x32xf32, #tpu.memory_space<vmem>>, %arg12: memref<32x112xf32, #tpu.memory_space<vmem>>, %arg13: memref<32x112xf32, #tpu.memory_space<vmem>>, %arg14: memref<32x32xf32, #tpu.memory_space<vmem>>, %arg15: memref<32x16xf32, #tpu.memory_space<vmem>>, %arg16: memref<1x16xf32, #tpu.memory_space<vmem>>, %arg17: memref<2x8x16xf32, #tpu.memory_space<vmem>>, %arg18: memref<2x8x32xf32, #tpu.memory_space<vmem>>, %arg19: memref<2x8x32xf32, #tpu.memory_space<vmem>>, %arg20: memref<2x8x32xf32, #tpu.memory_space<vmem>>, %arg21: memref<2x8x32xf32, #tpu.memory_space<vmem>>, %arg22: memref<2x8x32xf32, #tpu.memory_space<vmem>>) attributes {dimension_semantics = [#tpu.dimension_semantics<parallel>, #tpu.dimension_semantics<arbitrary>], iteration_bounds = array<i64: 1, 1>, scalar_prefetch = 0 : i64, scratch_operands = 4 : i64, tpu.core_type = #tpu.core_type<tc>, window_params = [{transform_indices = @transform_0, window_bounds = array<i64: 2, 8, 4>}, {transform_indices = @transform_1, window_bounds = array<i64: 2, 8, 8, 4>}, {transform_indices = @transform_2, window_bounds = array<i64: 2, 1, 4>}, {transform_indices = @transform_3, window_bounds = array<i64: 2, 8, 8>}, {transform_indices = @transform_4, window_bounds = array<i64: 2, 8, 32>}, {pipeline_mode = #tpu.pipeline_mode<synchronous>, transform_indices = @transform_5, window_bounds = array<i64: 4, 32>}, {pipeline_mode = #tpu.pipeline_mode<synchronous>, transform_indices = @transform_6, window_bounds = array<i64: 1, 32>}, {pipeline_mode = #tpu.pipeline_mode<synchronous>, transform_indices = @transform_7, window_bounds = array<i64: 4, 32>}, {pipeline_mode = #tpu.pipeline_mode<synchronous>, transform_indices = @transform_8, window_bounds = array<i64: 4, 32>}, {pipeline_mode = #tpu.pipeline_mode<synchronous>, transform_indices = @transform_9, window_bounds = array<i64: 1, 32>}, {pipeline_mode = #tpu.pipeline_mode<synchronous>, transform_indices = @transform_10, window_bounds = array<i64: 32, 112>}, {pipeline_mode = #tpu.pipeline_mode<synchronous>, transform_indices = @transform_11, window_bounds = array<i64: 32, 112>}, {pipeline_mode = #tpu.pipeline_mode<synchronous>, transform_indices = @transform_12, window_bounds = array<i64: 32, 32>}, {pipeline_mode = #tpu.pipeline_mode<synchronous>, transform_indices = @transform_13, window_bounds = array<i64: 32, 16>}, {pipeline_mode = #tpu.pipeline_mode<synchronous>, transform_indices = @transform_14, window_bounds = array<i64: 1, 16>}, {transform_indices = @transform_15, window_bounds = array<i64: 2, 8, 16>}, {transform_indices = @transform_16, window_bounds = array<i64: 2, 8, 32>}]} {
    %c0_i32 = arith.constant 0 : i32
    %0 = arith.cmpi eq, %arg1, %c0_i32 : i32
    %1 = arith.extui %0 : i1 to i32
    %c0_i32_0 = arith.constant 0 : i32
    %2 = arith.cmpi ne, %1, %c0_i32_0 : i32
    scf.if %2 {
      %c0_21 = arith.constant 0 : index
      %c0_22 = arith.constant 0 : index
      %c0_23 = arith.constant 0 : index
      %28 = vector.load %arg2[%c0_21, %c0_22, %c0_23] : memref<2x8x4xf32, #tpu.memory_space<vmem>>, vector<2x8x4xf32>
      %29 = vector.shape_cast %28 : vector<2x8x4xf32> to vector<16x4xf32>
      %c0_24 = arith.constant 0 : index
      %c0_25 = arith.constant 0 : index
      %c0_26 = arith.constant 0 : index
      %30 = vector.load %arg6[%c0_24, %c0_25, %c0_26] : memref<2x8x32xf32, #tpu.memory_space<vmem>>, vector<2x8x32xf32>
      %31 = vector.shape_cast %30 : vector<2x8x32xf32> to vector<16x32xf32>
      %c0_27 = arith.constant 0 : index
      %c0_28 = arith.constant 0 : index
      %32 = vector.load %arg7[%c0_27, %c0_28] : memref<4x32xf32, #tpu.memory_space<vmem>>, vector<4x32xf32>
      %cst_29 = arith.constant dense<0.000000e+00> : vector<16x32xf32>
      %33 = tpu.matmul %29, %32, %cst_29 {dimension_numbers = #tpu.dot_dimension_numbers<[1], [0], [0], [1], [0, 0, 1, 1], [], []>} : vector<16x4xf32>, vector<4x32xf32>, vector<16x32xf32> -> vector<16x32xf32>
      %c0_30 = arith.constant 0 : index
      %c0_31 = arith.constant 0 : index
      %34 = vector.load %arg8[%c0_30, %c0_31] : memref<1x32xf32, #tpu.memory_space<vmem>>, vector<1x32xf32>
      %35 = vector.broadcast %34 : vector<1x32xf32> to vector<16x32xf32>
      %36 = arith.addf %33, %35 : vector<16x32xf32>
      %c0_32 = arith.constant 0 : index
      %c0_33 = arith.constant 0 : index
      %37 = vector.load %arg12[%c0_32, %c0_33] : memref<32x112xf32, #tpu.memory_space<vmem>>, vector<32x112xf32>
      %cst_34 = arith.constant dense<0.000000e+00> : vector<16x112xf32>
      %38 = tpu.matmul %36, %37, %cst_34 {dimension_numbers = #tpu.dot_dimension_numbers<[1], [0], [0], [1], [0, 0, 1, 1], [], []>} : vector<16x32xf32>, vector<32x112xf32>, vector<16x112xf32> -> vector<16x112xf32>
      %c0_35 = arith.constant 0 : index
      %c0_36 = arith.constant 0 : index
      %39 = vector.load %arg13[%c0_35, %c0_36] : memref<32x112xf32, #tpu.memory_space<vmem>>, vector<32x112xf32>
      %cst_37 = arith.constant dense<0.000000e+00> : vector<16x112xf32>
      %40 = tpu.matmul %31, %39, %cst_37 {dimension_numbers = #tpu.dot_dimension_numbers<[1], [0], [0], [1], [0, 0, 1, 1], [], []>} : vector<16x32xf32>, vector<32x112xf32>, vector<16x112xf32> -> vector<16x112xf32>
      %41 = arith.addf %38, %40 : vector<16x112xf32>
      %42 = vector.extract_strided_slice %41 {offsets = [0, 0], sizes = [16, 32], strides = [1, 1]} : vector<16x112xf32> to vector<16x32xf32>
      %43 = vector.shape_cast %42 : vector<16x32xf32> to vector<2x8x32xf32>
      %c0_38 = arith.constant 0 : index
      %c0_39 = arith.constant 0 : index
      %c0_40 = arith.constant 0 : index
      %44 = vector.load %arg19[%c0_38, %c0_39, %c0_40] : memref<2x8x32xf32, #tpu.memory_space<vmem>>, vector<2x8x32xf32>
      tpu.vector_store %arg19[%c0_38, %c0_39, %c0_40], %43 {strides = array<i32>} : memref<2x8x32xf32, #tpu.memory_space<vmem>>, vector<2x8x32xf32>,
      %45 = vector.extract_strided_slice %41 {offsets = [0, 32], sizes = [16, 32], strides = [1, 1]} : vector<16x112xf32> to vector<16x32xf32>
      %46 = vector.shape_cast %45 : vector<16x32xf32> to vector<2x8x32xf32>
      %c0_41 = arith.constant 0 : index
      %c0_42 = arith.constant 0 : index
      %c0_43 = arith.constant 0 : index
      %47 = vector.load %arg20[%c0_41, %c0_42, %c0_43] : memref<2x8x32xf32, #tpu.memory_space<vmem>>, vector<2x8x32xf32>
      tpu.vector_store %arg20[%c0_41, %c0_42, %c0_43], %46 {strides = array<i32>} : memref<2x8x32xf32, #tpu.memory_space<vmem>>, vector<2x8x32xf32>,
      %48 = vector.extract_strided_slice %41 {offsets = [0, 64], sizes = [16, 32], strides = [1, 1]} : vector<16x112xf32> to vector<16x32xf32>
      %49 = vector.shape_cast %48 : vector<16x32xf32> to vector<2x8x32xf32>
      %c0_44 = arith.constant 0 : index
      %c0_45 = arith.constant 0 : index
      %c0_46 = arith.constant 0 : index
      %50 = vector.load %arg21[%c0_44, %c0_45, %c0_46] : memref<2x8x32xf32, #tpu.memory_space<vmem>>, vector<2x8x32xf32>
      tpu.vector_store %arg21[%c0_44, %c0_45, %c0_46], %49 {strides = array<i32>} : memref<2x8x32xf32, #tpu.memory_space<vmem>>, vector<2x8x32xf32>,
      %51 = vector.extract_strided_slice %41 {offsets = [0, 96], sizes = [16, 16], strides = [1, 1]} : vector<16x112xf32> to vector<16x16xf32>
      %c0_47 = arith.constant 0 : index
      %c0_48 = arith.constant 0 : index
      %52 = vector.load %arg16[%c0_47, %c0_48] : memref<1x16xf32, #tpu.memory_space<vmem>>, vector<1x16xf32>
      %53 = vector.broadcast %52 : vector<1x16xf32> to vector<16x16xf32>
      %54 = arith.addf %51, %53 : vector<16x16xf32>
      %55 = vector.shape_cast %54 : vector<16x16xf32> to vector<2x8x16xf32>
      %c0_49 = arith.constant 0 : index
      %c0_50 = arith.constant 0 : index
      %c0_51 = arith.constant 0 : index
      %56 = vector.load %arg17[%c0_49, %c0_50, %c0_51] : memref<2x8x16xf32, #tpu.memory_space<vmem>>, vector<2x8x16xf32>
      tpu.vector_store %arg17[%c0_49, %c0_50, %c0_51], %55 {strides = array<i32>} : memref<2x8x16xf32, #tpu.memory_space<vmem>>, vector<2x8x16xf32>,
      %cst_52 = arith.constant -1.000000e+09 : f32
      %57 = vector.broadcast %cst_52 : f32 to vector<2x8x32xf32>
      %c0_53 = arith.constant 0 : index
      %c0_54 = arith.constant 0 : index
      %c0_55 = arith.constant 0 : index
      %58 = vector.load %arg22[%c0_53, %c0_54, %c0_55] : memref<2x8x32xf32, #tpu.memory_space<vmem>>, vector<2x8x32xf32>
      tpu.vector_store %arg22[%c0_53, %c0_54, %c0_55], %57 {strides = array<i32>} : memref<2x8x32xf32, #tpu.memory_space<vmem>>, vector<2x8x32xf32>,
    } else {
    }
    %c0 = arith.constant 0 : index
    %c0_1 = arith.constant 0 : index
    %3 = vector.load %arg9[%c0, %c0_1] : memref<4x32xf32, #tpu.memory_space<vmem>>, vector<4x32xf32>
    %c8_i32 = arith.constant 8 : i32
    %4 = arith.muli %arg1, %c8_i32 : i32
    %5 = tpu.assume_multiple %4, 8 : i32
    %c0_i32_2 = arith.constant 0 : i32
    %6 = arith.addi %5, %c0_i32_2 : i32
    %7 = tpu.assume_multiple %6, 8 : i32
    %c0_3 = arith.constant 0 : index
    %c0_4 = arith.constant 0 : index
    %c0_5 = arith.constant 0 : index
    %c0_6 = arith.constant 0 : index
    %8 = vector.load %arg3[%c0_3, %c0_4, %c0_5, %c0_6] : memref<2x8x8x4xf32, #tpu.memory_space<vmem>>, vector<2x8x8x4xf32>
    %c0_7 = arith.constant 0 : index
    %c0_8 = arith.constant 0 : index
    %c0_9 = arith.constant 0 : index
    %9 = vector.load %arg5[%c0_7, %c0_8, %c0_9] : memref<2x8x8xf32, #tpu.memory_space<vmem>>, vector<2x8x8xf32>
    %c0_10 = arith.constant 0 : index
    %10 = arith.index_cast %7 : i32 to index
    %c0_11 = arith.constant 0 : index
    %11 = vector.load %arg20[%c0_10, %10, %c0_11] : memref<2x8x32xf32, #tpu.memory_space<vmem>>, vector<2x8x32xf32>
    %12 = vector.shape_cast %8 : vector<2x8x8x4xf32> to vector<128x4xf32>
    %cst = arith.constant dense<0.000000e+00> : vector<128x32xf32>
    %13 = tpu.matmul %12, %3, %cst {dimension_numbers = #tpu.dot_dimension_numbers<[1], [0], [0], [1], [0, 0, 1, 1], [], []>} : vector<128x4xf32>, vector<4x32xf32>, vector<128x32xf32> -> vector<128x32xf32>
    %14 = vector.shape_cast %13 : vector<128x32xf32> to vector<2x8x8x32xf32>
    %15 = vector.shape_cast %11 : vector<2x8x32xf32> to vector<2x8x1x32xf32>
    %16 = vector.broadcast %15 : vector<2x8x1x32xf32> to vector<2x8x8x32xf32>
    %17 = arith.addf %14, %16 : vector<2x8x8x32xf32>
    %18 = vector.shape_cast %9 : vector<2x8x8xf32> to vector<2x8x8x1xf32>
    %19 = vector.broadcast %18 : vector<2x8x8x1xf32> to vector<2x8x8x32xf32>
    %20 = arith.addf %17, %19 : vector<2x8x8x32xf32>
    %cst_12 = arith.constant dense<0xFF800000> : vector<2x8x32xf32>
    %21 = vector.multi_reduction <maximumf>, %20, %cst_12 [1] : vector<2x8x8x32xf32> to vector<2x8x32xf32>
    %c0_13 = arith.constant 0 : index
    %c0_14 = arith.constant 0 : index
    %c0_15 = arith.constant 0 : index
    %22 = vector.load %arg22[%c0_13, %c0_14, %c0_15] : memref<2x8x32xf32, #tpu.memory_space<vmem>>, vector<2x8x32xf32>
    %23 = arith.maximumf %22, %21 : vector<2x8x32xf32>
    %c0_16 = arith.constant 0 : index
    %c0_17 = arith.constant 0 : index
    %c0_18 = arith.constant 0 : index
    %24 = vector.load %arg22[%c0_16, %c0_17, %c0_18] : memref<2x8x32xf32, #tpu.memory_space<vmem>>, vector<2x8x32xf32>
    tpu.vector_store %arg22[%c0_16, %c0_17, %c0_18], %23 {strides = array<i32>} : memref<2x8x32xf32, #tpu.memory_space<vmem>>, vector<2x8x32xf32>,
    %c0_i32_19 = arith.constant 0 : i32
    %25 = arith.cmpi eq, %arg1, %c0_i32_19 : i32
    %26 = arith.extui %25 : i1 to i32
    %c0_i32_20 = arith.constant 0 : i32
    %27 = arith.cmpi ne, %26, %c0_i32_20 : i32
    scf.if %27 {
      %c0_21 = arith.constant 0 : index
      %c0_22 = arith.constant 0 : index
      %c0_23 = arith.constant 0 : index
      %28 = vector.load %arg4[%c0_21, %c0_22, %c0_23] : memref<2x1x4xf32, #tpu.memory_space<vmem>>, vector<2x1x4xf32>
      %29 = vector.shape_cast %28 : vector<2x1x4xf32> to vector<2x4xf32>
      %c0_24 = arith.constant 0 : index
      %c0_25 = arith.constant 0 : index
      %30 = vector.load %arg10[%c0_24, %c0_25] : memref<4x32xf32, #tpu.memory_space<vmem>>, vector<4x32xf32>
      %cst_26 = arith.constant dense<0.000000e+00> : vector<2x32xf32>
      %31 = tpu.matmul %29, %30, %cst_26 {dimension_numbers = #tpu.dot_dimension_numbers<[1], [0], [0], [1], [0, 0, 1, 1], [], []>} : vector<2x4xf32>, vector<4x32xf32>, vector<2x32xf32> -> vector<2x32xf32>
      %c0_27 = arith.constant 0 : index
      %c0_28 = arith.constant 0 : index
      %c0_29 = arith.constant 0 : index
      %32 = vector.load %arg22[%c0_27, %c0_28, %c0_29] : memref<2x8x32xf32, #tpu.memory_space<vmem>>, vector<2x8x32xf32>
      %c0_30 = arith.constant 0 : index
      %c0_31 = arith.constant 0 : index
      %c0_32 = arith.constant 0 : index
      %33 = vector.load %arg19[%c0_30, %c0_31, %c0_32] : memref<2x8x32xf32, #tpu.memory_space<vmem>>, vector<2x8x32xf32>
      %34 = arith.addf %32, %33 : vector<2x8x32xf32>
      %35 = vector.shape_cast %31 : vector<2x32xf32> to vector<2x1x32xf32>
      %36 = vector.broadcast %35 : vector<2x1x32xf32> to vector<2x8x32xf32>
      %37 = arith.addf %34, %36 : vector<2x8x32xf32>
      %c0_33 = arith.constant 0 : index
      %c0_34 = arith.constant 0 : index
      %38 = vector.load %arg11[%c0_33, %c0_34] : memref<1x32xf32, #tpu.memory_space<vmem>>, vector<1x32xf32>
      %39 = vector.shape_cast %38 : vector<1x32xf32> to vector<1x1x32xf32>
      %40 = vector.broadcast %39 : vector<1x1x32xf32> to vector<2x8x32xf32>
      %41 = arith.addf %37, %40 : vector<2x8x32xf32>
      %42 = vector.shape_cast %41 : vector<2x8x32xf32> to vector<16x32xf32>
      %c0_35 = arith.constant 0 : index
      %c0_36 = arith.constant 0 : index
      %c0_37 = arith.constant 0 : index
      %43 = vector.load %arg21[%c0_35, %c0_36, %c0_37] : memref<2x8x32xf32, #tpu.memory_space<vmem>>, vector<2x8x32xf32>
      %44 = vector.shape_cast %43 : vector<2x8x32xf32> to vector<16x32xf32>
      %c0_38 = arith.constant 0 : index
      %c0_39 = arith.constant 0 : index
      %45 = vector.load %arg14[%c0_38, %c0_39] : memref<32x32xf32, #tpu.memory_space<vmem>>, vector<32x32xf32>
      %cst_40 = arith.constant dense<0.000000e+00> : vector<16x32xf32>
      %46 = tpu.matmul %42, %45, %cst_40 {dimension_numbers = #tpu.dot_dimension_numbers<[1], [0], [0], [1], [0, 0, 1, 1], [], []>} : vector<16x32xf32>, vector<32x32xf32>, vector<16x32xf32> -> vector<16x32xf32>
      %47 = arith.addf %44, %46 : vector<16x32xf32>
      %cst_41 = arith.constant 0.000000e+00 : f32
      %48 = vector.broadcast %cst_41 : f32 to vector<16x32xf32>
      %49 = arith.maximumf %47, %48 : vector<16x32xf32>
      %c0_42 = arith.constant 0 : index
      %c0_43 = arith.constant 0 : index
      %c0_44 = arith.constant 0 : index
      %50 = vector.load %arg17[%c0_42, %c0_43, %c0_44] : memref<2x8x16xf32, #tpu.memory_space<vmem>>, vector<2x8x16xf32>
      %c0_45 = arith.constant 0 : index
      %c0_46 = arith.constant 0 : index
      %51 = vector.load %arg15[%c0_45, %c0_46] : memref<32x16xf32, #tpu.memory_space<vmem>>, vector<32x16xf32>
      %cst_47 = arith.constant dense<0.000000e+00> : vector<16x16xf32>
      %52 = tpu.matmul %49, %51, %cst_47 {dimension_numbers = #tpu.dot_dimension_numbers<[1], [0], [0], [1], [0, 0, 1, 1], [], []>} : vector<16x32xf32>, vector<32x16xf32>, vector<16x16xf32> -> vector<16x16xf32>
      %53 = vector.shape_cast %52 : vector<16x16xf32> to vector<2x8x16xf32>
      %54 = arith.addf %50, %53 : vector<2x8x16xf32>
      %c0_48 = arith.constant 0 : index
      %c0_49 = arith.constant 0 : index
      %c0_50 = arith.constant 0 : index
      %55 = vector.load %arg17[%c0_48, %c0_49, %c0_50] : memref<2x8x16xf32, #tpu.memory_space<vmem>>, vector<2x8x16xf32>
      tpu.vector_store %arg17[%c0_48, %c0_49, %c0_50], %54 {strides = array<i32>} : memref<2x8x16xf32, #tpu.memory_space<vmem>>, vector<2x8x16xf32>,
      %56 = vector.shape_cast %49 : vector<16x32xf32> to vector<2x8x32xf32>
      %c0_51 = arith.constant 0 : index
      %c0_52 = arith.constant 0 : index
      %c0_53 = arith.constant 0 : index
      %57 = vector.load %arg18[%c0_51, %c0_52, %c0_53] : memref<2x8x32xf32, #tpu.memory_space<vmem>>, vector<2x8x32xf32>
      tpu.vector_store %arg18[%c0_51, %c0_52, %c0_53], %56 {strides = array<i32>} : memref<2x8x32xf32, #tpu.memory_space<vmem>>, vector<2x8x32xf32>,
    } else {
    }
    return
  }
  func.func @transform_0(%arg0: i32, %arg1: i32) -> (i32, i32, i32) {
    %c0_i32 = arith.constant 0 : i32
    %c0_i32_0 = arith.constant 0 : i32
    %c0_i32_1 = arith.constant 0 : i32
    return %arg0, %c0_i32, %c0_i32_0 : i32, i32, i32
  }
  func.func @transform_1(%arg0: i32, %arg1: i32) -> (i32, i32, i32, i32) {
    %c0_i32 = arith.constant 0 : i32
    %c0_i32_0 = arith.constant 0 : i32
    %c0_i32_1 = arith.constant 0 : i32
    return %arg0, %arg1, %c0_i32, %c0_i32_0 : i32, i32, i32, i32
  }
  func.func @transform_2(%arg0: i32, %arg1: i32) -> (i32, i32, i32) {
    %c0_i32 = arith.constant 0 : i32
    %c0_i32_0 = arith.constant 0 : i32
    %c0_i32_1 = arith.constant 0 : i32
    return %arg0, %c0_i32, %c0_i32_0 : i32, i32, i32
  }
  func.func @transform_3(%arg0: i32, %arg1: i32) -> (i32, i32, i32) {
    %c0_i32 = arith.constant 0 : i32
    %c0_i32_0 = arith.constant 0 : i32
    return %arg0, %arg1, %c0_i32 : i32, i32, i32
  }
  func.func @transform_4(%arg0: i32, %arg1: i32) -> (i32, i32, i32) {
    %c0_i32 = arith.constant 0 : i32
    %c0_i32_0 = arith.constant 0 : i32
    %c0_i32_1 = arith.constant 0 : i32
    return %arg0, %c0_i32, %c0_i32_0 : i32, i32, i32
  }
  func.func @transform_5(%arg0: i32, %arg1: i32) -> (i32, i32) {
    %c0_i32 = arith.constant 0 : i32
    %c0_i32_0 = arith.constant 0 : i32
    %c0_i32_1 = arith.constant 0 : i32
    return %c0_i32, %c0_i32_0 : i32, i32
  }
  func.func @transform_6(%arg0: i32, %arg1: i32) -> (i32, i32) {
    %c0_i32 = arith.constant 0 : i32
    %c0_i32_0 = arith.constant 0 : i32
    %c0_i32_1 = arith.constant 0 : i32
    return %c0_i32, %c0_i32_0 : i32, i32
  }
  func.func @transform_7(%arg0: i32, %arg1: i32) -> (i32, i32) {
    %c0_i32 = arith.constant 0 : i32
    %c0_i32_0 = arith.constant 0 : i32
    %c0_i32_1 = arith.constant 0 : i32
    return %c0_i32, %c0_i32_0 : i32, i32
  }
  func.func @transform_8(%arg0: i32, %arg1: i32) -> (i32, i32) {
    %c0_i32 = arith.constant 0 : i32
    %c0_i32_0 = arith.constant 0 : i32
    %c0_i32_1 = arith.constant 0 : i32
    return %c0_i32, %c0_i32_0 : i32, i32
  }
  func.func @transform_9(%arg0: i32, %arg1: i32) -> (i32, i32) {
    %c0_i32 = arith.constant 0 : i32
    %c0_i32_0 = arith.constant 0 : i32
    %c0_i32_1 = arith.constant 0 : i32
    return %c0_i32, %c0_i32_0 : i32, i32
  }
  func.func @transform_10(%arg0: i32, %arg1: i32) -> (i32, i32) {
    %c0_i32 = arith.constant 0 : i32
    %c0_i32_0 = arith.constant 0 : i32
    %c0_i32_1 = arith.constant 0 : i32
    return %c0_i32, %c0_i32_0 : i32, i32
  }
  func.func @transform_11(%arg0: i32, %arg1: i32) -> (i32, i32) {
    %c0_i32 = arith.constant 0 : i32
    %c0_i32_0 = arith.constant 0 : i32
    %c0_i32_1 = arith.constant 0 : i32
    return %c0_i32, %c0_i32_0 : i32, i32
  }
  func.func @transform_12(%arg0: i32, %arg1: i32) -> (i32, i32) {
    %c0_i32 = arith.constant 0 : i32
    %c0_i32_0 = arith.constant 0 : i32
    %c0_i32_1 = arith.constant 0 : i32
    return %c0_i32, %c0_i32_0 : i32, i32
  }
  func.func @transform_13(%arg0: i32, %arg1: i32) -> (i32, i32) {
    %c0_i32 = arith.constant 0 : i32
    %c0_i32_0 = arith.constant 0 : i32
    %c0_i32_1 = arith.constant 0 : i32
    return %c0_i32, %c0_i32_0 : i32, i32
  }
  func.func @transform_14(%arg0: i32, %arg1: i32) -> (i32, i32) {
    %c0_i32 = arith.constant 0 : i32
    %c0_i32_0 = arith.constant 0 : i32
    %c0_i32_1 = arith.constant 0 : i32
    return %c0_i32, %c0_i32_0 : i32, i32
  }
  func.func @transform_15(%arg0: i32, %arg1: i32) -> (i32, i32, i32) {
    %c0_i32 = arith.constant 0 : i32
    %c0_i32_0 = arith.constant 0 : i32
    %c0_i32_1 = arith.constant 0 : i32
    return %arg0, %c0_i32, %c0_i32_0 : i32, i32, i32
  }
  func.func @transform_16(%arg0: i32, %arg1: i32) -> (i32, i32, i32) {
    %c0_i32 = arith.constant 0 : i32
    %c0_i32_0 = arith.constant 0 : i32
    %c0_i32_1 = arith.constant 0 : i32
    return %arg0, %c0_i32, %c0_i32_0 : i32, i32, i32
  }
}

</mosaic_0001>

<bundles_post_ra>
// kernel: tpu_custom_call.1
= control target key start
LH: loop header
LB: loop body
LE: loop exit
PB: predicated region body
PF: predicated region fallthrough
CT: control target
= control target key end

     0   :  { %s2739_s0 = inlined_call_operand.hbm [shape: f32[2,8,4], index: 0, kind: input, shape index: {}]   ;;  %s2740_s1 = inlined_call_operand.hbm [shape: f32[2,8,8,4], index: 1, kind: input, shape index: {}]   ;;  %s2741_s2 = inlined_call_operand.hbm [shape: f32[2,1,4], index: 2, kind: input, shape index: {}]   ;;  %s2742_s3 = inlined_call_operand.hbm [shape: f32[2,8,8], index: 3, kind: input, shape index: {}]   ;;  %s2743_s4 = inlined_call_operand.hbm [shape: f32[2,8,32], index: 4, kind: input, shape index: {}]   ;;  %s2744_s5 = inlined_call_operand.hbm [shape: f32[4,32], index: 5, kind: input, shape index: {}]   ;;  %s2745_s6 = inlined_call_operand.hbm [shape: f32[1,32], index: 6, kind: input, shape index: {}]   ;;  %s2746_s7 = inlined_call_operand.hbm [shape: f32[4,32], index: 7, kind: input, shape index: {}]   ;;  %s2747_s8 = inlined_call_operand.hbm [shape: f32[4,32], index: 8, kind: input, shape index: {}]   ;;  %s2748_s9 = inlined_call_operand.hbm [shape: f32[1,32], index: 9, kind: input, shape index: {}]   ;;  %s2749_s10 = inlined_call_operand.hbm [shape: f32[32,112], index: 10, kind: input, shape index: {}]   ;;  %s2750_s11 = inlined_call_operand.hbm [shape: f32[32,112], index: 11, kind: input, shape index: {}]   ;;  %s2751_s12 = inlined_call_operand.hbm [shape: f32[32,32], index: 12, kind: input, shape index: {}]   ;;  %s2752_s13 = inlined_call_operand.hbm [shape: f32[32,16], index: 13, kind: input, shape index: {}]   ;;  %s2753_s14 = inlined_call_operand.hbm [shape: f32[1,16], index: 14, kind: input, shape index: {}]   ;;  %s2754_s15 = inlined_call_operand.hbm [shape: f32[2,8,16], index: 15, kind: output, shape index: {0}]   ;;  %s2755_s16 = inlined_call_operand.hbm [shape: f32[2,8,32], index: 16, kind: output, shape index: {1}]  }
   0x1   :  { %2757 = sst [smem:[#allocation43_spill]] %s2739_s0 }
   0x2   :  { %22 = vsyncpa [#allocation7], 0 }
   0x3   :  { %23 = vsyncpa [#allocation10], 0 }
   0x4   :  { %24 = vsyncpa [#allocation13], 0 }
   0x5   :  { %25 = vsyncpa [#allocation16], 0 }
   0x6   :  { %26 = vsyncpa [#allocation19], 0 }
   0x7   :  { %27 = vsyncpa [#allocation22], 0 }
   0x8   :  { %28 = vsyncpa [#allocation25], 0 }
   0x9   :  { %29 = vsyncpa [#allocation28], 0 }
   0xa   :  { %30 = vsyncpa [#allocation8], 0 }
   0xb   :  { %31 = vsyncpa [#allocation32], 0  ;;  %s2134_s21 = smov [#allocation9]   ;;  %s2135_s23 = smov [#allocation12]  }
   0xc   :  { %s49_s22 = sshll.u32 %s2134_s21, 4  ;;  %s73_s24 = sshll.u32 %s2135_s23, 4  ;;  %s50_s22 = int_to_ptr.vmem [resolvable:$true] %s49_s22  ;;  %s2247_s24 = int_to_ptr.vmem [resolvable:$true] %s73_s24 }
   0xd   :  { %s1740_s27 = scalar_lea.hbm %s2740_s1, 2048 }
   0xe   :  { %p1741_p0 = scmp.ne.s32.totalorder %s2740_s1, %s1740_s27  ;;  %p1744_p1 = scmp.lt.u32.totalorder %s1740_s27, %s2740_s1 }
  0x10   :  { %p1746_p2 = pnand %p1744_p1, %p1741_p0 }
  0x12   :  { %1749 = shalt.err (!%p1746_p2)
}
  0x13   :  { %s1750_s17 = scalar_lea.vmem %s50_s22, 2048  ;;  %p1755_p4 = scmp.lt.s32.totalorder %s50_s22, %s50_s22 }
  0x14   :  { %p1751_p3 = scmp.ne.s32.totalorder %s50_s22, %s1750_s17  ;;  %p1756_p5 = scmp.lt.s32.totalorder %s1750_s17, %s1750_s17 }
  0x16   :  { %p1757_p6 = por %p1756_p5, %p1755_p4 }
  0x18   :  { %p1758_p7 = pnand %p1757_p6, %p1751_p3 }
  0x1a   :  { %1761 = shalt.err (!%p1758_p7)
}
  0x1b   :  { %s2136_s18 = smov 128   ;;  %s2137_s19 = smov 8  }
  0x1c   :  { %55 = dma.hbm_to_vmem [thread:$0]  %s2740_s1, 2048, %s50_s22, [#allocation10], %s2136_s18, %s2136_s18, %s2137_s19  }
  0x1d   :  { %s1762_s26 = scalar_lea.hbm %s2742_s3, 256 }
  0x1e   :  { %p1763_p8 = scmp.ne.s32.totalorder %s2742_s3, %s1762_s26  ;;  %p1766_p9 = scmp.lt.u32.totalorder %s1762_s26, %s2742_s3 }
  0x20   :  { %p1768_p10 = pnand %p1766_p9, %p1763_p8 }
  0x22   :  { %1771 = shalt.err (!%p1768_p10)
}
  0x23   :  { %s1772_s0 = scalar_lea.vmem %s2247_s24, 256  ;;  %p1777_p12 = scmp.lt.s32.totalorder %s2247_s24, %s2247_s24 }
  0x24   :  { %p1773_p11 = scmp.ne.s32.totalorder %s2247_s24, %s1772_s0  ;;  %p1778_p13 = scmp.lt.s32.totalorder %s1772_s0, %s1772_s0 }
  0x26   :  { %p1779_p0 = por %p1778_p13, %p1777_p12 }
  0x28   :  { %p1780_p1 = pnand %p1779_p0, %p1773_p11 }
  0x2a   :  { %1783 = shalt.err (!%p1780_p1)
}
  0x2b   :  { %79 = dma.hbm_to_vmem [thread:$0]  %s2742_s3, 256, %s2247_s24, [#allocation13], %s2136_s18, %s2136_s18, %s2137_s19  }
  0x2c   :  { %s2138_s17 = smov [#allocation15]   ;;  %s2139_s21 = smov [#allocation18]  }
  0x2d   :  { %s98_s20 = sshll.u32 %s2138_s17, 4  ;;  %s118_s23 = sshll.u32 %s2139_s21, 4  ;;  %s99_s20 = int_to_ptr.vmem [resolvable:$true] %s98_s20  ;;  %s119_s23 = int_to_ptr.vmem [resolvable:$true] %s118_s23 }
  0x2e   :  { %s1784_s27 = scalar_lea.hbm %s2744_s5, 64 }
  0x2f   :  { %p1785_p2 = scmp.ne.s32.totalorder %s2744_s5, %s1784_s27  ;;  %p1788_p3 = scmp.lt.u32.totalorder %s1784_s27, %s2744_s5 }
  0x31   :  { %p1790_p4 = pnand %p1788_p3, %p1785_p2 }
  0x33   :  { %1793 = shalt.err (!%p1790_p4)
}
  0x34   :  { %s1794_s3 = scalar_lea.vmem %s99_s20, 64  ;;  %p1799_p6 = scmp.lt.s32.totalorder %s99_s20, %s99_s20 }
  0x35   :  { %p1795_p5 = scmp.ne.s32.totalorder %s99_s20, %s1794_s3  ;;  %p1800_p7 = scmp.lt.s32.totalorder %s1794_s3, %s1794_s3 }
  0x37   :  { %p1801_p8 = por %p1800_p7, %p1799_p6 }
  0x39   :  { %p1802_p9 = pnand %p1801_p8, %p1795_p5 }
  0x3b   :  { %1805 = shalt.err (!%p1802_p9)
}
  0x3c   :  { %101 = dma.hbm_to_vmem [thread:$0]  %s2744_s5, 64, %s99_s20, [#allocation16]  }
  0x3d   :  { %s1806_s21 = scalar_lea.hbm %s2746_s7, 64 }
  0x3e   :  { %p1807_p10 = scmp.ne.s32.totalorder %s2746_s7, %s1806_s21  ;;  %p1810_p11 = scmp.lt.u32.totalorder %s1806_s21, %s2746_s7 }
  0x40   :  { %p1812_p12 = pnand %p1810_p11, %p1807_p10 }
  0x42   :  { %1815 = shalt.err (!%p1812_p12)
}
  0x43   :  { %s1816_s29 = scalar_lea.vmem %s119_s23, 64  ;;  %p1821_p0 = scmp.lt.s32.totalorder %s119_s23, %s119_s23 }
  0x44   :  { %p1817_p13 = scmp.ne.s32.totalorder %s119_s23, %s1816_s29  ;;  %p1822_p1 = scmp.lt.s32.totalorder %s1816_s29, %s1816_s29 }
  0x46   :  { %p1823_p2 = por %p1822_p1, %p1821_p0 }
  0x48   :  { %p1824_p3 = pnand %p1823_p2, %p1817_p13 }
  0x4a   :  { %1827 = shalt.err (!%p1824_p3)
}
  0x4b   :  { %121 = dma.hbm_to_vmem [thread:$0]  %s2746_s7, 64, %s119_s23, [#allocation19]  }
  0x4c   :  { %s2140_s30 = smov [#allocation21]   ;;  %s2141_s3 = smov [#allocation24]  }
  0x4d   :  { %s138_s0 = sshll.u32 %s2140_s30, 4  ;;  %s159_s24 = sshll.u32 %s2141_s3, 4  ;;  %s139_s0 = int_to_ptr.vmem [resolvable:$true] %s138_s0  ;;  %s2308_s24 = int_to_ptr.vmem [resolvable:$true] %s159_s24 }
  0x4e   :  { %s1828_s17 = scalar_lea.hbm %s2748_s9, 16 }
  0x4f   :  { %p1829_p4 = scmp.ne.s32.totalorder %s2748_s9, %s1828_s17  ;;  %p1832_p5 = scmp.lt.u32.totalorder %s1828_s17, %s2748_s9 }
  0x51   :  { %p1834_p6 = pnand %p1832_p5, %p1829_p4 }
  0x53   :  { %1837 = shalt.err (!%p1834_p6)
}
  0x54   :  { %s1838_s7 = scalar_lea.vmem %s139_s0, 16  ;;  %s1842_s23 = scalar_lea.vmem %s139_s0, 32 }
  0x55   :  { %p1839_p7 = scmp.ne.s32.totalorder %s139_s0, %s1838_s7  ;;  %p1843_p8 = scmp.lt.s32.totalorder %s139_s0, %s139_s0 }
  0x56   :  { %p1844_p9 = scmp.lt.s32.totalorder %s1842_s23, %s1838_s7 }
  0x58   :  { %p1845_p10 = por %p1844_p9, %p1843_p8 }
  0x5a   :  { %p1846_p11 = pnand %p1845_p10, %p1839_p7 }
  0x5c   :  { %1849 = shalt.err (!%p1846_p11)
}
  0x5d   :  { %141 = dma.hbm_to_vmem [thread:$0]  %s2748_s9, 16, %s139_s0, [#allocation22]  }
  0x5e   :  { %s1850_s30 = scalar_lea.hbm %s2750_s11, 512 }
  0x5f   :  { %p1851_p12 = scmp.ne.s32.totalorder %s2750_s11, %s1850_s30  ;;  %p1854_p13 = scmp.lt.u32.totalorder %s1850_s30, %s2750_s11 }
  0x61   :  { %p1856_p0 = pnand %p1854_p13, %p1851_p12 }
  0x63   :  { %1859 = shalt.err (!%p1856_p0)
}
  0x64   :  { %s1860_s21 = scalar_lea.vmem %s2308_s24, 512  ;;  %p1865_p2 = scmp.lt.s32.totalorder %s2308_s24, %s2308_s24 }
  0x65   :  { %p1861_p1 = scmp.ne.s32.totalorder %s2308_s24, %s1860_s21  ;;  %p1866_p3 = scmp.lt.s32.totalorder %s1860_s21, %s1860_s21 }
  0x67   :  { %p1867_p4 = por %p1866_p3, %p1865_p2 }
  0x69   :  { %p1868_p5 = pnand %p1867_p4, %p1861_p1 }
  0x6b   :  { %1871 = shalt.err (!%p1868_p5)
}
  0x6c   :  { %165 = dma.hbm_to_vmem [thread:$0]  %s2750_s11, 512, %s2308_s24, [#allocation25], %s2136_s18, %s2136_s18, %s2137_s19  }
  0x6d   :  { %s2142_s25 = smov [#allocation27]   ;;  %s2143_s27 = smov [#allocation6]  }
  0x6e   :  { %s183_s26 = sshll.u32 %s2142_s25, 4  ;;  %s37_s7 = sshll.u32 %s2143_s27, 4  ;;  %s184_s26 = int_to_ptr.vmem [resolvable:$true] %s183_s26  ;;  %s2342_s7 = int_to_ptr.vmem [resolvable:$true] %s37_s7 }
  0x6f   :  { %s1872_s29 = scalar_lea.hbm %s2752_s13, 512 }
  0x70   :  { %p1873_p6 = scmp.ne.s32.totalorder %s2752_s13, %s1872_s29  ;;  %p1876_p7 = scmp.lt.u32.totalorder %s1872_s29, %s2752_s13 }
  0x72   :  { %p1878_p8 = pnand %p1876_p7, %p1873_p6 }
  0x74   :  { %1881 = shalt.err (!%p1878_p8)
}
  0x75   :  { %s1882_s11 = scalar_lea.vmem %s184_s26, 512  ;;  %p1887_p10 = scmp.lt.s32.totalorder %s184_s26, %s184_s26 }
  0x76   :  { %p1883_p9 = scmp.ne.s32.totalorder %s184_s26, %s1882_s11  ;;  %p1888_p11 = scmp.lt.s32.totalorder %s1882_s11, %s1882_s11 }
  0x78   :  { %p1889_p12 = por %p1888_p11, %p1887_p10 }
  0x7a   :  { %p1890_p13 = pnand %p1889_p12, %p1883_p9 }
  0x7c   :  { %1893 = shalt.err (!%p1890_p13)
}
  0x7d   :  { %189 = dma.hbm_to_vmem [thread:$0]  %s2752_s13, 512, %s184_s26, [#allocation28], %s2136_s18, %s2136_s18, %s2137_s19  }
  0x7e   :  { %s2758_s21 = sld [smem:[#allocation43_spill]] }
  0x84   :  { %s1894_s9 = scalar_lea.hbm %s2758_s21, 256 }
  0x85   :  { %p1895_p0 = scmp.ne.s32.totalorder %s2758_s21, %s1894_s9  ;;  %p1898_p1 = scmp.lt.u32.totalorder %s1894_s9, %s2758_s21 }
  0x87   :  { %p1900_p2 = pnand %p1898_p1, %p1895_p0 }
  0x89   :  { %1903 = shalt.err (!%p1900_p2)
}
  0x8a   :  { %s1904_s28 = scalar_lea.vmem %s2342_s7, 256  ;;  %p1909_p4 = scmp.lt.s32.totalorder %s2342_s7, %s2342_s7 }
  0x8b   :  { %p1905_p3 = scmp.ne.s32.totalorder %s2342_s7, %s1904_s28  ;;  %p1910_p5 = scmp.lt.s32.totalorder %s1904_s28, %s1904_s28 }
  0x8d   :  { %p1911_p6 = por %p1910_p5, %p1909_p4 }
  0x8f   :  { %p1912_p7 = pnand %p1911_p6, %p1905_p3 }
  0x91   :  { %1915 = shalt.err (!%p1912_p7)
}
  0x92   :  { %43 = dma.hbm_to_vmem [thread:$0]  %s2758_s21, 256, %s2342_s7, [#allocation7], %s2136_s18, %s2136_s18, %s2137_s19  }
  0x93   :  { %s2144_s29 = smov [#allocation11]   ;;  %s1916_s3 = scalar_lea.hbm %s2741_s2, 32 }
  0x94   :  { %s61_s5 = sshll.u32 %s2144_s29, 4  ;;  %p1917_p8 = scmp.ne.s32.totalorder %s2741_s2, %s1916_s3  ;;  %s62_s5 = int_to_ptr.vmem [resolvable:$true] %s61_s5 }
  0x95   :  { %p1920_p9 = scmp.lt.u32.totalorder %s1916_s3, %s2741_s2 }
  0x97   :  { %p1922_p10 = pnand %p1920_p9, %p1917_p8 }
  0x99   :  { %1925 = shalt.err (!%p1922_p10)
}
  0x9a   :  { %s1926_s17 = scalar_lea.vmem %s62_s5, 32  ;;  %p1931_p12 = scmp.lt.s32.totalorder %s62_s5, %s62_s5 }
  0x9b   :  { %p1927_p11 = scmp.ne.s32.totalorder %s62_s5, %s1926_s17  ;;  %p1932_p13 = scmp.lt.s32.totalorder %s1926_s17, %s1926_s17 }
  0x9d   :  { %p1933_p0 = por %p1932_p13, %p1931_p12 }
  0x9f   :  { %p1934_p1 = pnand %p1933_p0, %p1927_p11 }
  0xa1   :  { %1937 = shalt.err (!%p1934_p1)
}
  0xa2   :  { %s2145_s7 = smov 16   ;;  %s2146_s21 = smov 1  }
  0xa3   :  { %67 = dma.hbm_to_vmem [thread:$0]  %s2741_s2, 32, %s62_s5, [#allocation10], %s2145_s7, %s2145_s7, %s2146_s21  }
  0xa4   :  { %s2147_s25 = smov [#allocation14]   ;;  %s2148_s23 = smov [#allocation17]  }
  0xa5   :  { %s85_s27 = sshll.u32 %s2147_s25, 4  ;;  %s108_s28 = sshll.u32 %s2148_s23, 4  ;;  %s86_s27 = int_to_ptr.vmem [resolvable:$true] %s85_s27  ;;  %s109_s28 = int_to_ptr.vmem [resolvable:$true] %s108_s28 }
  0xa6   :  { %s1938_s29 = scalar_lea.hbm %s2743_s4, 256 }
  0xa7   :  { %p1939_p2 = scmp.ne.s32.totalorder %s2743_s4, %s1938_s29  ;;  %p1942_p3 = scmp.lt.u32.totalorder %s1938_s29, %s2743_s4 }
  0xa9   :  { %p1944_p4 = pnand %p1942_p3, %p1939_p2 }
  0xab   :  { %1947 = shalt.err (!%p1944_p4)
}
  0xac   :  { %s1948_s2 = scalar_lea.vmem %s86_s27, 256  ;;  %p1953_p6 = scmp.lt.s32.totalorder %s86_s27, %s86_s27 }
  0xad   :  { %p1949_p5 = scmp.ne.s32.totalorder %s86_s27, %s1948_s2  ;;  %p1954_p7 = scmp.lt.s32.totalorder %s1948_s2, %s1948_s2 }
  0xaf   :  { %p1955_p8 = por %p1954_p7, %p1953_p6 }
  0xb1   :  { %p1956_p9 = pnand %p1955_p8, %p1949_p5 }
  0xb3   :  { %1959 = shalt.err (!%p1956_p9)
}
  0xb4   :  { %91 = dma.hbm_to_vmem [thread:$0]  %s2743_s4, 256, %s86_s27, [#allocation13], %s2136_s18, %s2136_s18, %s2137_s19  }
  0xb5   :  { %s1960_s17 = scalar_lea.hbm %s2745_s6, 16 }
  0xb6   :  { %p1961_p10 = scmp.ne.s32.totalorder %s2745_s6, %s1960_s17  ;;  %p1964_p11 = scmp.lt.u32.totalorder %s1960_s17, %s2745_s6 }
  0xb8   :  { %p1966_p12 = pnand %p1964_p11, %p1961_p10 }
  0xba   :  { %1969 = shalt.err (!%p1966_p12)
}
  0xbb   :  { %s1970_s25 = scalar_lea.vmem %s109_s28, 16  ;;  %s1974_s23 = scalar_lea.vmem %s109_s28, 32 }
  0xbc   :  { %p1971_p13 = scmp.ne.s32.totalorder %s109_s28, %s1970_s25  ;;  %p1975_p0 = scmp.lt.s32.totalorder %s109_s28, %s109_s28 }
  0xbd   :  { %p1976_p1 = scmp.lt.s32.totalorder %s1974_s23, %s1970_s25 }
  0xbf   :  { %p1977_p2 = por %p1976_p1, %p1975_p0 }
  0xc1   :  { %p1978_p3 = pnand %p1977_p2, %p1971_p13 }
  0xc3   :  { %1981 = shalt.err (!%p1978_p3)
}
  0xc4   :  { %111 = dma.hbm_to_vmem [thread:$0]  %s2745_s6, 16, %s109_s28, [#allocation16]  }
  0xc5   :  { %s2149_s13 = smov [#allocation20]   ;;  %s2150_s29 = smov [#allocation23]  }
  0xc6   :  { %s128_s26 = sshll.u32 %s2149_s13, 4  ;;  %s147_s20 = sshll.u32 %s2150_s29, 4  ;;  %s129_s26 = int_to_ptr.vmem [resolvable:$true] %s128_s26  ;;  %s148_s20 = int_to_ptr.vmem [resolvable:$true] %s147_s20 }
  0xc7   :  { %s1982_s11 = scalar_lea.hbm %s2747_s8, 64 }
  0xc8   :  { %p1983_p4 = scmp.ne.s32.totalorder %s2747_s8, %s1982_s11  ;;  %p1986_p5 = scmp.lt.u32.totalorder %s1982_s11, %s2747_s8 }
  0xca   :  { %p1988_p6 = pnand %p1986_p5, %p1983_p4 }
  0xcc   :  { %1991 = shalt.err (!%p1988_p6)
}
  0xcd   :  { %s1992_s6 = scalar_lea.vmem %s129_s26, 64  ;;  %p1997_p8 = scmp.lt.s32.totalorder %s129_s26, %s129_s26 }
  0xce   :  { %p1993_p7 = scmp.ne.s32.totalorder %s129_s26, %s1992_s6  ;;  %p1998_p9 = scmp.lt.s32.totalorder %s1992_s6, %s1992_s6 }
  0xd0   :  { %p1999_p10 = por %p1998_p9, %p1997_p8 }
  0xd2   :  { %p2000_p11 = pnand %p1999_p10, %p1993_p7 }
  0xd4   :  { %2003 = shalt.err (!%p2000_p11)
}
  0xd5   :  { %131 = dma.hbm_to_vmem [thread:$0]  %s2747_s8, 64, %s129_s26, [#allocation19]  }
  0xd6   :  { %s2004_s21 = scalar_lea.hbm %s2749_s10, 512 }
  0xd7   :  { %p2005_p12 = scmp.ne.s32.totalorder %s2749_s10, %s2004_s21  ;;  %p2008_p13 = scmp.lt.u32.totalorder %s2004_s21, %s2749_s10 }
  0xd9   :  { %p2010_p0 = pnand %p2008_p13, %p2005_p12 }
  0xdb   :  { %2013 = shalt.err (!%p2010_p0)
}
  0xdc   :  { %s2014_s4 = scalar_lea.vmem %s148_s20, 512  ;;  %p2019_p2 = scmp.lt.s32.totalorder %s148_s20, %s148_s20 }
  0xdd   :  { %p2015_p1 = scmp.ne.s32.totalorder %s148_s20, %s2014_s4  ;;  %p2020_p3 = scmp.lt.s32.totalorder %s2014_s4, %s2014_s4 }
  0xdf   :  { %p2021_p4 = por %p2020_p3, %p2019_p2 }
  0xe1   :  { %p2022_p5 = pnand %p2021_p4, %p2015_p1 }
  0xe3   :  { %2025 = shalt.err (!%p2022_p5)
}
  0xe4   :  { %153 = dma.hbm_to_vmem [thread:$0]  %s2749_s10, 512, %s148_s20, [#allocation22], %s2136_s18, %s2136_s18, %s2137_s19  }
  0xe5   :  { %s2151_s13 = smov [#allocation26]   ;;  %s2152_s29 = smov [#allocation29]  }
  0xe6   :  { %s171_s26 = sshll.u32 %s2151_s13, 4  ;;  %s196_s30 = sshll.u32 %s2152_s29, 4  ;;  %s172_s26 = int_to_ptr.vmem [resolvable:$true] %s171_s26  ;;  %s197_s30 = int_to_ptr.vmem [resolvable:$true] %s196_s30 }
  0xe7   :  { %s2026_s2 = scalar_lea.hbm %s2751_s12, 512 }
  0xe8   :  { %p2027_p6 = scmp.ne.s32.totalorder %s2751_s12, %s2026_s2  ;;  %p2030_p7 = scmp.lt.u32.totalorder %s2026_s2, %s2751_s12 }
  0xea   :  { %p2032_p8 = pnand %p2030_p7, %p2027_p6 }
  0xec   :  { %2035 = shalt.err (!%p2032_p8)
}
  0xed   :  { %s2036_s10 = scalar_lea.vmem %s172_s26, 512  ;;  %p2041_p10 = scmp.lt.s32.totalorder %s172_s26, %s172_s26 }
  0xee   :  { %p2037_p9 = scmp.ne.s32.totalorder %s172_s26, %s2036_s10  ;;  %p2042_p11 = scmp.lt.s32.totalorder %s2036_s10, %s2036_s10 }
  0xf0   :  { %p2043_p12 = por %p2042_p11, %p2041_p10 }
  0xf2   :  { %p2044_p13 = pnand %p2043_p12, %p2037_p9 }
  0xf4   :  { %2047 = shalt.err (!%p2044_p13)
}
  0xf5   :  { %177 = dma.hbm_to_vmem [thread:$0]  %s2751_s12, 512, %s172_s26, [#allocation25], %s2136_s18, %s2136_s18, %s2137_s19  }
  0xf6   :  { %s2048_s7 = scalar_lea.hbm %s2753_s14, 16 }
  0xf7   :  { %p2049_p0 = scmp.ne.s32.totalorder %s2753_s14, %s2048_s7  ;;  %p2052_p1 = scmp.lt.u32.totalorder %s2048_s7, %s2753_s14 }
  0xf9   :  { %p2054_p2 = pnand %p2052_p1, %p2049_p0 }
  0xfb   :  { %2057 = shalt.err (!%p2054_p2)
}
  0xfc   :  { %s2058_s23 = scalar_lea.vmem %s197_s30, 16  ;;  %s2062_s4 = scalar_lea.vmem %s197_s30, 32 }
  0xfd   :  { %p2059_p3 = scmp.ne.s32.totalorder %s197_s30, %s2058_s23  ;;  %p2063_p4 = scmp.lt.s32.totalorder %s197_s30, %s197_s30 }
  0xfe   :  { %p2064_p5 = scmp.lt.s32.totalorder %s2062_s4, %s2058_s23 }
 0x100   :  { %p2065_p6 = por %p2064_p5, %p2063_p4 }
 0x102   :  { %p2066_p7 = pnand %p2065_p6, %p2059_p3 }
 0x104   :  { %2069 = shalt.err (!%p2066_p7)
}
 0x105   :  { %199 = dma.hbm_to_vmem [thread:$0]  %s2753_s14, 16, %s197_s30, [#allocation28]  }
 0x106   :  { %2114 = dma.done.wait [#allocation7], 256  }
 0x107   :  { %2115 = vsyncadd [#allocation7], 4294967040 }
 0x108   :  { %2116 = dma.done.wait [#allocation10], 2080  }
 0x109   :  { %2117 = vsyncadd [#allocation10], 4294965216 }
 0x10a   :  { %2118 = dma.done.wait [#allocation13], 512  }
 0x10b   :  { %2119 = vsyncadd [#allocation13], 4294966784 }
 0x10c   :  { %2120 = dma.done.wait [#allocation16], 80  }
 0x10d   :  { %2121 = vsyncadd [#allocation16], 4294967216 }
 0x10e   :  { %2122 = dma.done.wait [#allocation19], 128  }
 0x10f   :  { %2123 = vsyncadd [#allocation19], 4294967168 }
 0x110   :  { %2124 = dma.done.wait [#allocation22], 528  }
 0x111   :  { %2125 = vsyncadd [#allocation22], 4294966768 }
 0x112   :  { %2126 = dma.done.wait [#allocation25], 1024  }
 0x113   :  { %2127 = vsyncadd [#allocation25], 4294966272 }
 0x114   :  { %2128 = dma.done.wait [#allocation28], 528  }
 0x115   :  { %2129 = vsyncadd [#allocation28], 4294966768  ;;  %vm268_vm0 = vcmask 1043456   ;;  %vm261_vm1 = vcmask 31744   ;;  %v253_v0 = vld [vmem:[#allocation15] sm:$0xf]  ;;  %v789_v21 = vlaneseq }
 0x116   :  { %v249_v1 = vld [vmem:[#allocation6] sm:$0xff]  ;;  %v250_v2 = vld [vmem:[#allocation6 + $0x8] sm:$0xff]  ;;  %vm355_vm2 = vcmask 261120   ;;  %1596 = vmatprep.subr.msk.mxu0 %vm268_vm0, %v253_v0  ;;  %v353_v5 = vld [vmem:[#allocation24 + $0x10] sm:$0xff]  ;;  %v2153_v22 = vmov 0.0   ;;  %vm2155_vm3 = vmmov 0  }
 0x117   :  { %1598 = vmatprep.mubr.msk.f32.mxu0 %vm261_vm1, %v249_v1  ;;  %v351_v3 = vld [vmem:[#allocation24] sm:$0xff]  ;;  %v352_v4 = vld [vmem:[#allocation24 + $0x8] sm:$0xff]  ;;  %1597 = vmatpush3.msk.msra.mxu0 %vm268_vm0, %v253_v0  ;;  %v354_v7 = vld [vmem:[#allocation24 + $0x18] sm:$0xff]  ;;  %v2483_v23 = vshrl.u32 %v789_v21, 7  ;;  %v2154_v53 = vmov 1966171168  }
 0x118   :  { %v1676_v6 = vpack.c.bf16 %v352_v4, %v351_v3  ;;  %v251_v8 = vld [vmem:[#allocation14] sm:$0xff]  ;;  %1599 = vmatmul.mubr.msk.f32.vlgmr.msra.gmra.mrb[0].mxu0 %vm261_vm1, %v250_v2  ;;  %v1680_v9 = vpack.c.bf16 %v354_v7, %v353_v5  ;;  %v348_v11 = vld [vmem:[#allocation23 + $0x8] sm:$0xff]  ;;  %v349_v14 = vld [vmem:[#allocation23 + $0x10] sm:$0xff]  ;;  %v787_v54 = vunpack.c.l.s4 %v2154_v53  ;;  %s2156_s14 = smov 64   ;;  %s2157_s27 = smov 96   ;;  %vm557_vm4 = vcmask 130048  }
 0x119   :  { %1609 = vmatprep.mubr.msk.f32.mxu1 %vm355_vm2, %v251_v8  ;;  %v347_v10 = vld [vmem:[#allocation23] sm:$0xff]  ;;  %v252_v13 = vld [vmem:[#allocation14 + $0x8] sm:$0xff]  ;;  %v350_v15 = vld [vmem:[#allocation23 + $0x18] sm:$0xff]  ;;  %v2487_v26 = vsub.s32 0, %v2483_v23  ;;  %v988_v27 = vsub.s32 1, %v2483_v23  ;;  %v1002_v33 = vsub.s32 3, %v2483_v23 }
 0x11a   :  { %1677 = vmatprep.subr.bf16.mxu1 %v1676_v6  ;;  %v1684_v12 = vpack.c.bf16 %v348_v11, %v347_v10  ;;  %v1688_v16 = vpack.c.bf16 %v350_v15, %v349_v14  ;;  %v562_v17 = vld [vmem:[#allocation18] sm:$0xf]  ;;  %v564_v18 = vld [vmem:[#allocation9] sm:$0xff]  ;;  %v566_v20 = vld [vmem:[#allocation9 + $0x10] sm:$0xff]  ;;  %v1016_v44 = vsub.s32 5, %v2483_v23  ;;  %v1030_v50 = vsub.s32 7, %v2483_v23 }
 0x11b   :  { %1679 = vmatpush3.bf16.msra.mxu1 %v1676_v6  ;;  %v565_v19 = vld [vmem:[#allocation9 + $0x8] sm:$0xff]  ;;  %1623 = vmatprep.subr.msk.mxu0 %vm268_vm0, %v562_v17  ;;  %v567_v24 = vld [vmem:[#allocation9 + $0x18] sm:$0xff]  ;;  %v568_v25 = vld [vmem:[#allocation9 + $0x20] sm:$0xff]  ;;  %v788_v55 = vunpack.c.0.s8 %v787_v54  ;;  %v995_v15 = vsub.s32 2, %v2483_v23  ;;  %s2159_s13 = smov 32   ;;  %s2160_s26 = smov [#allocation31]  }
 0x11c   :  { %1681 = vmatprep.subr.bf16.mxu1 %v1680_v9  ;;  %1625 = vmatprep.mubr.msk.f32.mxu0 %vm261_vm1, %v564_v18  ;;  %v2490_v28 = vld [vmem:[#allocation12] sm:$0xff]  ;;  %v570_v31 = vld [vmem:[#allocation9 + $0x30] sm:$0xff]  ;;  %v571_v34 = vld [vmem:[#allocation9 + $0x38] sm:$0xff]  ;;  %s1494_s29 = sshll.u32 %s2160_s26, 4  ;;  %s1495_s29 = int_to_ptr.vmem [resolvable:$true] %s1494_s29 }
 0x11d   :  { %1624 = vmatpush3.msk.msra.mxu0 %vm268_vm0, %v562_v17  ;;  %v982_v29 = vrot.slane %v2490_v28, %v2487_v26  ;;  %v569_v30 = vld [vmem:[#allocation9 + $0x28] sm:$0xff]  ;;  %v989_v32 = vrot.slane %v2490_v28, %v988_v27  ;;  %v572_v35 = vld [vmem:[#allocation9 + $0x40] sm:$0xff]  ;;  %v1003_v36 = vrot.slane %v2490_v28, %v1002_v33  ;;  %v574_v39 = vld [vmem:[#allocation9 + $0x50] sm:$0xff]  ;;  %v1017_v47 = vrot.slane %v2490_v28, %v1016_v44  ;;  %s2070_s30 = scalar_lea.vmem %s1495_s29, 256  ;;  %p2075_p9 = scmp.lt.s32.totalorder %s1495_s29, %s1495_s29 }
 0x11e   :  { %1626 = vmatmul.mubr.msk.f32.vlgmr.msra.gmra.mrb[2].mxu0 %vm261_vm1, %v565_v19  ;;  %v2501_v37 = vld [vmem:[#allocation12 + $0x8] sm:$0xff]  ;;  %v575_v41 = vld [vmem:[#allocation9 + $0x58] sm:$0xff]  ;;  %v576_v42 = vld [vmem:[#allocation9 + $0x60] sm:$0xff]  ;;  %v1031_v51 = vrot.slane %v2490_v28, %v1030_v50  ;;  %v2521_v58 = vsub.s32 %v788_v55, %v2483_v23  ;;  %v996_v17 = vrot.slane %v2490_v28, %v995_v15  ;;  %p2071_p8 = scmp.ne.s32.totalorder %s1495_s29, %s2070_s30  ;;  %p2076_p10 = scmp.lt.s32.totalorder %s2070_s30, %s2070_s30 }
 0x11f   :  { %1683 = vmatpush3.bf16.msra.mxu1 %v1680_v9  ;;  %1628 = vmatprep.mubr.msk.f32.mxu0 %vm261_vm1, %v566_v20  ;;  %v573_v38 = vld [vmem:[#allocation9 + $0x48] sm:$0xff]  ;;  %v1045_v40 = vrot.slane %v2501_v37, %v988_v27  ;;  %v1059_v43 = vrot.slane %v2501_v37, %v1002_v33  ;;  %v578_v46 = vld [vmem:[#allocation9 + $0x70] sm:$0xff]  ;;  %v579_v48 = vld [vmem:[#allocation9 + $0x78] sm:$0xff]  ;;  %v1073_v49 = vrot.slane %v2501_v37, %v1016_v44 }
 0x120   :  { %1685 = vmatprep.subr.bf16.mxu1 %v1684_v12  ;;  %984 = vbcast.lane.b32.xlu1 %v982_v29, 256  ;;  %v577_v45 = vld [vmem:[#allocation9 + $0x68] sm:$0xff]  ;;  %v1087_v52 = vrot.slane %v2501_v37, %v1030_v50  ;;  %v1147_v56 = vld [vmem:[#allocation11] sm:$0x1]  ;;  %v1148_v57 = vld [vmem:[#allocation11 + $0x1] sm:$0x1]  ;;  %v1038_v20 = vrot.slane %v2501_v37, %v2487_v26  ;;  %p2077_p11 = por %p2076_p10, %p2075_p9 }
 0x121   :  { %v1152_v59 = vcombine.low %v1147_v56, %v1148_v57  ;;  %v1517_v60 = vld [vmem:[#allocation17] ss:$0 sm:$0xff]  ;;  %v1149_v2 = vld [vmem:[#allocation20] sm:$0xf] }
 0x122   :  { %1610 = vmatmul.mubr.msk.f32.vlgmr.msra.gmra.mrb[0].mxu1 %vm355_vm2, %v252_v13  ;;  %1629 = vmatmul.mubr.msk.f32.gmra.mrb[4].mxu0 %vm261_vm1, %v567_v24  ;;  %v1009_v24 = vsub.s32 4, %v2483_v23  ;;  %p2078_p12 = pnand %p2077_p11, %p2071_p8 }
 0x123   :  { %1687 = vmatpush3.bf16.msra.mxu1 %v1684_v12  ;;  %1631 = vmatprep.mubr.msk.f32.mxu0 %vm261_vm1, %v568_v25  ;;  %v1159_v63 = vrot.slane %v1152_v59, %v2521_v58 }
 0x124   :  { %1689 = vmatprep.subr.bf16.mxu1 %v1688_v16  ;;  %991 = vbcast.lane.b32.xlu1 %v989_v32, 256  ;;  %v1010_v27 = vrot.slane %v2490_v28, %v1009_v24  ;;  %v1023_v32 = vsub.s32 6, %v2483_v23  ;;  %v1294_v23 = vld [vmem:[#allocation26] sm:$0xff] }
 0x125   :  { %v1166_v3 = vrot.slane %v1159_v63, %v2521_v58 }
 0x126   :  { %1632 = vmatmul.mubr.msk.f32.gmra.mrb[6].mxu0 %vm261_vm1, %v569_v30  ;;  %v1024_v33 = vrot.slane %v2490_v28, %v1023_v32  ;;  %v1295_v28 = vld [vmem:[#allocation26 + $0x8] sm:$0xff] }
 0x127   :  { %1691 = vmatpush3.bf16.msra.mxu1 %v1688_v16  ;;  %1634 = vmatprep.mubr.msk.f32.mxu0 %vm261_vm1, %v570_v31  ;;  %v1066_v31 = vrot.slane %v2501_v37, %v1009_v24 }
 0x128   :  { %1649 = vmatprep.subr.mxu1 %v2153_v22  ;;  %1005 = vbcast.lane.b32.xlu1 %v1003_v36, 256 }
 0x12a   :  { %1635 = vmatmul.mubr.msk.f32.gmra.mrb[8].mxu0 %vm261_vm1, %v571_v34  ;;  %v2158_v34 = vmov -1e+09  }
 0x12b   :  { %1637 = vmatprep.mubr.msk.f32.mxu0 %vm261_vm1, %v572_v35  ;;  %560 = vst.msk [vmem:[#allocation5] sm:$0xff] %vm355_vm2, %v2158_v34  ;;  %561 = vst.msk [vmem:[#allocation5 + $0x8] sm:$0xff] %vm355_vm2, %v2158_v34  ;;  %v1080_v35 = vrot.slane %v2501_v37, %v1023_v32 }
 0x12c   :  { %1047 = vbcast.lane.b32.xlu1 %v1045_v40, 256  ;;  %v1296_v40 = vld [vmem:[#allocation26 + $0x10] sm:$0xff] }
 0x12e   :  { %1638 = vmatmul.mubr.msk.f32.gmra.mrb[10].mxu0 %vm261_vm1, %v573_v38 }
 0x12f   :  { %1640 = vmatprep.mubr.msk.f32.mxu0 %vm261_vm1, %v574_v39  ;;  %v1525_v39 = vld [vmem:[#allocation29] ss:$0 sm:$0xff] }
 0x130   :  { %1061 = vbcast.lane.b32.xlu1 %v1059_v43, 256 }
 0x132   :  { %1641 = vmatmul.mubr.msk.f32.gmra.mrb[12].mxu0 %vm261_vm1, %v575_v41  ;;  %v1692_v41 = vpack.c.bf16 %v1295_v28, %v1294_v23 }
 0x133   :  { %1643 = vmatprep.mubr.msk.f32.mxu0 %vm261_vm1, %v576_v42  ;;  %v1297_v42 = vld [vmem:[#allocation26 + $0x18] sm:$0xff] }
 0x134   :  { %1019 = vbcast.lane.b32.xlu1 %v1017_v47, 256  ;;  %v1696_v43 = vpack.c.bf16 %v1297_v42, %v1296_v40 }
 0x136   :  { %1644 = vmatmul.mubr.msk.f32.gmra.mrb[14].mxu0 %vm261_vm1, %v577_v45 }
 0x137   :  { %1646 = vmatprep.mubr.msk.f32.mxu0 %vm261_vm1, %v578_v46 }
 0x138   :  { %1075 = vbcast.lane.b32.xlu1 %v1073_v49, 256 }
 0x13a   :  { %1647 = vmatmul.mubr.msk.f32.gmra.mrb[16].mxu0 %vm261_vm1, %v579_v48 }
 0x13c   :  { %1033 = vbcast.lane.b32.xlu1 %v1031_v51, 256 }
 0x140   :  { %1089 = vbcast.lane.b32.xlu1 %v1087_v52, 256 }
 0x1eb   :  { %v1600_v61 = vpop.f32.mrb[0].mxu0 }
 0x1ec   :  { %v338_v62 = vpop.f32.mrb[1].mxu0  ;;  %v344_v1 = vadd.f32 %v1600_v61, %v1517_v60 }
 0x1ed   :  { %v339_v0 = vadd.f32 %v1517_v60, %v338_v62 }
 0x1ef   :  { %1620 = vmatprep.mubr.msk.f32.mxu1 %vm355_vm2, %v339_v0 }
 0x1f0   :  { %1621 = vmatmul.mubr.msk.f32.vlgmr.msra.gmra.mrb[0].mxu1 %vm355_vm2, %v344_v1 }
 0x1f1   :  { %1650 = vmatpush3.msk.msra.mxu1 %vm268_vm0, %v1149_v2  ;;  %1651 = vmatprep.mubr.msk.f32.mxu1 %vm2155_vm3, %v2153_v22  ;;  %v2530_v4 = vpop.f32.mrb[2].mxu0  ;;  %v1052_v22 = vrot.slane %v2501_v37, %v995_v15  ;;  %v985_v37 = vpop.permute.xlu1 %984 }
 0x1f2   :  { %v2532_v5 = vpop.f32.mrb[3].mxu0  ;;  %1693 = vmatprep.subr.bf16.mxu1 %v1692_v41 }
 0x1f4   :  { %1652 = vmatmul.mubr.msk.f32.vlgmr.msra.gmra.mrb[2].mxu1 %vm261_vm1, %v1166_v3 }
 0x1f5   :  { %v2534_v6 = vpop.f32.mrb[4].mxu0  ;;  %1695 = vmatpush3.bf16.msra.mxu1 %v1692_v41  ;;  %v2594_v44 = vpop.permute.xlu1 %991 }
 0x1f6   :  { %v2536_v7 = vpop.f32.mrb[5].mxu0  ;;  %1697 = vmatprep.subr.bf16.mxu1 %v1696_v43 }
 0x1f9   :  { %v2538_v8 = vpop.f32.mrb[6].mxu0  ;;  %1699 = vmatpush3.bf16.msra.mxu1 %v1696_v43  ;;  %v2596_v45 = vpop.permute.xlu1 %1005 }
 0x1fa   :  { %v2540_v9 = vpop.f32.mrb[7].mxu0 }
 0x1fd   :  { %v2542_v10 = vpop.f32.mrb[8].mxu0  ;;  %v1048_v46 = vpop.permute.xlu1 %1047 }
 0x1fe   :  { %v2544_v11 = vpop.f32.mrb[9].mxu0 }
 0x201   :  { %v2546_v12 = vpop.f32.mrb[10].mxu0  ;;  %v2598_v47 = vpop.permute.xlu1 %1061 }
 0x202   :  { %v2561_v16 = vpop.f32.mrb[11].mxu0 }
 0x205   :  { %v2566_v18 = vpop.f32.mrb[12].mxu0  ;;  %v2600_v48 = vpop.permute.xlu1 %1019 }
 0x206   :  { %v2568_v19 = vpop.f32.mrb[13].mxu0 }
 0x209   :  { %v2572_v21 = vpop.f32.mrb[14].mxu0  ;;  %v2602_v49 = vpop.permute.xlu1 %1075 }
 0x20a   :  { %v2576_v25 = vpop.f32.mrb[15].mxu0 }
 0x20d   :  { %v2579_v29 = vpop.f32.mrb[16].mxu0  ;;  %v2604_v50 = vpop.permute.xlu1 %1033 }
 0x20e   :  { %v2581_v30 = vpop.f32.mrb[17].mxu0 }
 0x211   :  { %v2606_v51 = vpop.permute.xlu1 %1089 }
 0x2c3   :  { %v2548_v13 = vpop.f32.mrb[0].mxu1 }
 0x2c4   :  { %519 = vst.msk [vmem:[#allocation2 + $0x8] sm:$0xff] %vm355_vm2, %v2548_v13  ;;  %532 = vrot.lane.b32.xlu1 %v2548_v13, %s2156_s14  ;;  %524 = vrot.lane.b32.xlu0 %v2548_v13, %s2157_s27  ;;  %v2556_v14 = vpop.f32.mrb[1].mxu1 }
 0x2c5   :  { %518 = vst.msk [vmem:[#allocation2] sm:$0xff] %vm355_vm2, %v2556_v14 }
 0x2c7   :  { %v2589_v36 = vpop.f32.mrb[2].mxu1 }
 0x2c8   :  { %522 = vrot.lane.b32.xlu0 %v2556_v14, %s2157_s27  ;;  %v1653_v38 = vpop.f32.mrb[3].mxu1 }
 0x2cc   :  { %998 = vbcast.lane.b32.xlu0 %v996_v17, 256 }
 0x2d0   :  { %1040 = vbcast.lane.b32.xlu0 %v1038_v20, 256 }
 0x2d4   :  { %1054 = vbcast.lane.b32.xlu0 %v1052_v22, 256 }
 0x2d8   :  { %1012 = vbcast.lane.b32.xlu0 %v1010_v27, 256 }
 0x2dc   :  { %1068 = vbcast.lane.b32.xlu0 %v1066_v31, 256 }
 0x2e0   :  { %1026 = vbcast.lane.b32.xlu0 %v1024_v33, 256 }
 0x2e4   :  { %1082 = vbcast.lane.b32.xlu0 %v1080_v35, 256 }
 0x2e8   :  { %530 = vrot.lane.b32.xlu0 %v2556_v14, %s2156_s14 }
 0x2ec   :  { %544 = vrot.lane.b32.xlu0 %v1525_v39, %s2157_s27 }
 0x336   :  { %v533_v52 = vpop.permute.xlu1 %532  ;;  %v525_v53 = vpop.permute.xlu0 %524 }
 0x337   :  { %537 = vst.msk [vmem:[#allocation4 + $0x8] sm:$0xff] %vm355_vm2, %v533_v52  ;;  %529 = vst.msk [vmem:[#allocation3 + $0x8] sm:$0xff] %vm355_vm2, %v525_v53 }
 0x33a   :  { %v523_v54 = vpop.permute.xlu0 %522 }
 0x33b   :  { %528 = vst.msk [vmem:[#allocation3] sm:$0xff] %vm355_vm2, %v523_v54 }
 0x33e   :  { %v999_v55 = vpop.permute.xlu0 %998  ;;  %v584_v56 = vld [vmem:[#allocation3 + $0x8] sm:$0xff] }
 0x33f   :  { %v841_v57 = vrot.slane %v584_v56, %v2521_v58  ;;  %v834_v59 = vcombine.high %v584_v56, %v584_v56 }
 0x341   :  { %v849_v60 = vcombine.high %v841_v57, %v841_v57  ;;  %v857_v61 = vrot.slane %v841_v57, %v2521_v58  ;;  %v848_v62 = vrot.slane %v834_v59, %v2521_v58 }
 0x342   :  { %v583_v63 = vld [vmem:[#allocation3] sm:$0xff]  ;;  %v1041_v0 = vpop.permute.xlu0 %1040 }
 0x343   :  { %v792_v1 = vrot.slane %v583_v63, %v2521_v58  ;;  %v785_v2 = vcombine.high %v583_v63, %v583_v63  ;;  %v871_v3 = vrot.slane %v849_v60, %v2521_v58  ;;  %v918_v15 = vrot.slane %v857_v61, %v2487_v26 }
 0x344   :  { %v879_v17 = vcombine.high %v857_v61, %v857_v61  ;;  %v850_v20 = vcombine.high %v848_v62, %v848_v62  ;;  %v2618_v22 = vrot.slane %v848_v62, %v2521_v58 }
 0x345   :  { %v800_v24 = vcombine.high %v792_v1, %v792_v1  ;;  %v808_v27 = vrot.slane %v792_v1, %v2521_v58  ;;  %v799_v31 = vrot.slane %v785_v2, %v2521_v58  ;;  %v922_v32 = vrot.slane %v871_v3, %v2487_v26 }
 0x346   :  { %v971_v33 = vadd.f32 %v918_v15, %v2561_v16  ;;  %v881_v34 = vcombine.high %v871_v3, %v871_v3  ;;  %v926_v35 = vrot.slane %v879_v17, %v2487_v26  ;;  %v2626_v38 = vrot.slane %v850_v20, %v2521_v58  ;;  %v1055_v39 = vpop.permute.xlu0 %1054 }
 0x347   :  { %v822_v23 = vrot.slane %v800_v24, %v2521_v58  ;;  %v830_v28 = vcombine.high %v808_v27, %v808_v27  ;;  %v886_v40 = vrot.slane %v808_v27, %v2487_v26  ;;  %v801_v41 = vcombine.high %v799_v31, %v799_v31 }
 0x348   :  { %v815_v42 = vrot.slane %v799_v31, %v2521_v58  ;;  %v972_v43 = vadd.f32 %v2546_v12, %v922_v32  ;;  %v1099_v52 = vadd.f32 %v1041_v0, %v971_v33  ;;  %v930_v16 = vrot.slane %v881_v34, %v2487_v26 }
 0x349   :  { %v832_v53 = vcombine.high %v822_v23, %v822_v23  ;;  %v894_v54 = vrot.slane %v830_v28, %v2487_v26  ;;  %v829_v56 = vrot.slane %v801_v41, %v2521_v58  ;;  %v890_v57 = vrot.slane %v822_v23, %v2487_v26 }
 0x34a   :  { %v902_v59 = vrot.slane %v815_v42, %v2487_v26  ;;  %v963_v60 = vadd.f32 %v886_v40, %v2532_v5  ;;  %v831_v61 = vcombine.high %v815_v42, %v815_v42  ;;  %v1100_v62 = vadd.f32 %v1048_v46, %v972_v43  ;;  %v1013_v63 = vpop.permute.xlu0 %1012 }
 0x34b   :  { %v965_v1 = vadd.f32 %v894_v54, %v2536_v7  ;;  %v898_v12 = vrot.slane %v832_v53, %v2487_v26  ;;  %v906_v0 = vrot.slane %v829_v56, %v2487_v26  ;;  %v964_v2 = vadd.f32 %v2530_v4, %v890_v57 }
 0x34c   :  { %v967_v3 = vadd.f32 %v902_v59, %v2540_v9  ;;  %v1091_v15 = vadd.f32 %v985_v37, %v963_v60  ;;  %v833_v17 = vcombine.high %v829_v56, %v829_v56  ;;  %v910_v20 = vrot.slane %v831_v61, %v2487_v26  ;;  %v1386_v59 = vld [vmem:[#allocation27 + $0x8] sm:$0xff] }
 0x34d   :  { %v966_v24 = vadd.f32 %v2534_v6, %v898_v12  ;;  %v968_v5 = vadd.f32 %v2538_v8, %v906_v0  ;;  %v1092_v46 = vadd.f32 %v2594_v44, %v964_v2  ;;  %v1093_v27 = vadd.f32 %v999_v55, %v965_v1 }
 0x34e   :  { %v1108_v7 = vsel %vm355_vm2, %v1091_v15, -inf  ;;  %v914_v31 = vrot.slane %v833_v17, %v2487_v26  ;;  %v969_v32 = vadd.f32 %v910_v20, %v2544_v11  ;;  %v1124_v4 = vsel %vm355_vm2, %v1100_v62, -inf  ;;  %v1069_v9 = vpop.permute.xlu0 %1068 }
 0x34f   :  { %v1094_v37 = vadd.f32 %v2596_v45, %v966_v24  ;;  %v1096_v33 = vadd.f32 %v2600_v48, %v968_v5  ;;  %v1109_v6 = vsel %vm355_vm2, %v1092_v46, -inf  ;;  %v1110_v8 = vsel %vm355_vm2, %v1093_v27, -inf }
 0x350   :  { %v1111_v34 = vmax.f32 %v1108_v7, %v1110_v8  ;;  %v970_v44 = vadd.f32 %v2542_v10, %v914_v31  ;;  %v1123_v55 = vsel %vm355_vm2, %v1099_v52, -inf  ;;  %v974_v23 = vadd.f32 %v2566_v18, %v930_v16  ;;  %v1138_v31 = vld [vmem:[#allocation5] sm:$0xff] }
 0x351   :  { %v1112_v11 = vsel %vm355_vm2, %v1094_v37, -inf  ;;  %v1116_v28 = vsel %vm355_vm2, %v1096_v33, -inf  ;;  %v973_v40 = vadd.f32 %v926_v35, %v2568_v19  ;;  %v938_v45 = vrot.slane %v2626_v38, %v2487_v26 }
 0x352   :  { %v1113_v48 = vmax.f32 %v1109_v6, %v1112_v11  ;;  %v1098_v41 = vadd.f32 %v2604_v50, %v970_v44  ;;  %v1102_v42 = vadd.f32 %v2598_v47, %v974_v23  ;;  %v934_v10 = vrot.slane %v2618_v22, %v2487_v26  ;;  %v1027_v43 = vpop.permute.xlu0 %1026 }
 0x353   :  { %v976_v18 = vadd.f32 %v2572_v21, %v938_v45  ;;  %v1101_v52 = vadd.f32 %v1055_v39, %v973_v40  ;;  %v882_v16 = vcombine.high %v2626_v38, %v2626_v38  ;;  %v880_v19 = vcombine.high %v2618_v22, %v2618_v22  ;;  %v1385_v39 = vld [vmem:[#allocation27] sm:$0xff] }
 0x354   :  { %v1117_v35 = vmax.f32 %v1113_v48, %v1116_v28  ;;  %v1120_v53 = vsel %vm355_vm2, %v1098_v41, -inf  ;;  %v1127_v50 = vsel %vm355_vm2, %v1102_v42, -inf  ;;  %v975_v47 = vadd.f32 %v934_v10, %v2576_v25  ;;  %v1244_v45 = vld [vmem:[#allocation2] sm:$0xff]  ;;  %v1245_v41 = vld [vmem:[#allocation2 + $0x8] sm:$0xff] }
 0x355   :  { %v1128_v54 = vmax.f32 %v1124_v4, %v1127_v50  ;;  %v1104_v56 = vadd.f32 %v2602_v49, %v976_v18  ;;  %v1125_v57 = vsel %vm355_vm2, %v1101_v52, -inf  ;;  %v946_v21 = vrot.slane %v882_v16, %v2487_v26  ;;  %v1545_v42 = vld [vmem:[#allocation21] ss:$0 sm:$0xff]  ;;  %v1293_v50 = vld [vmem:[#allocation4 + $0x8] sm:$0xff] }
 0x356   :  { %v1121_v38 = vmax.f32 %v1117_v35, %v1120_v53  ;;  %v1126_v60 = vmax.f32 %v1123_v55, %v1125_v57  ;;  %v942_v22 = vrot.slane %v880_v19, %v2487_v26  ;;  %v1095_v61 = vadd.f32 %v1013_v63, %v967_v3  ;;  %v1083_v62 = vpop.permute.xlu0 %1082  ;;  %v1388_v19 = vld [vmem:[#allocation27 + $0x18] sm:$0xff] }
 0x357   :  { %v1131_v1 = vsel %vm355_vm2, %v1104_v56, -inf  ;;  %v978_v12 = vadd.f32 %v2579_v29, %v946_v21  ;;  %v1103_v25 = vadd.f32 %v1069_v9, %v975_v47  ;;  %v1097_v0 = vadd.f32 %v1027_v43, %v969_v32  ;;  %v1139_v9 = vld [vmem:[#allocation5 + $0x8] sm:$0xff] }
 0x358   :  { %v1132_v2 = vmax.f32 %v1128_v54, %v1131_v1  ;;  %v977_v49 = vadd.f32 %v942_v22, %v2581_v30  ;;  %v1114_v15 = vsel %vm355_vm2, %v1095_v61, -inf  ;;  %v1700_v17 = vpack.c.bf16 %v1386_v59, %v1385_v39 }
 0x359   :  { %v1106_v20 = vadd.f32 %v2606_v51, %v978_v12  ;;  %v1115_v24 = vmax.f32 %v1111_v34, %v1114_v15  ;;  %v1129_v5 = vsel %vm355_vm2, %v1103_v25, -inf  ;;  %v1118_v63 = vsel %vm355_vm2, %v1097_v0, -inf }
 0x35a   :  { %v1130_v3 = vmax.f32 %v1126_v60, %v1129_v5  ;;  %v1105_v46 = vadd.f32 %v1083_v62, %v977_v49  ;;  %v531_v27 = vpop.permute.xlu0 %530  ;;  %1701 = vmatprep.subr.bf16.mxu1 %v1700_v17  ;;  %v1255_v33 = vrot.slane %v2589_v36, %v2521_v58 }
 0x35b   :  { %v1135_v29 = vsel %vm355_vm2, %v1106_v20, -inf  ;;  %v1119_v7 = vmax.f32 %v1115_v24, %v1118_v63  ;;  %536 = vst.msk [vmem:[#allocation4] sm:$0xff] %vm355_vm2, %v531_v27 }
 0x35c   :  { %v1136_v30 = vmax.f32 %v1132_v2, %v1135_v29  ;;  %v1133_v32 = vsel %vm355_vm2, %v1105_v46, -inf  ;;  %v1256_v23 = vcombine.high %v1255_v33, %v1255_v33  ;;  %v1263_v11 = vrot.slane %v1255_v33, %v2521_v58 }
 0x35d   :  { %v1122_v4 = vmax.f32 %v1119_v7, %v1121_v38  ;;  %v1134_v51 = vmax.f32 %v1130_v3, %v1133_v32 }
 0x35e   :  { %v545_v37 = vpop.permute.xlu0 %544  ;;  %v1270_v28 = vrot.slane %v1256_v23, %v2521_v58  ;;  %v1274_v36 = vrot.slane %v1263_v11, %v2487_v26  ;;  %v1387_v58 = vld [vmem:[#allocation27 + $0x10] sm:$0xff] }
 0x35f   :  { %v1140_v6 = vmax.f32 %v1138_v31, %v1122_v4  ;;  %v1137_v8 = vmax.f32 %v1134_v51, %v1136_v30  ;;  %v547_v34 = vadd.f32 %v545_v37, %v2556_v14  ;;  %v548_v44 = vadd.f32 %v2548_v13, %v545_v37 }
 0x360   :  { %v1278_v13 = vrot.slane %v1270_v28, %v2487_v26  ;;  %v1704_v35 = vpack.c.bf16 %v1388_v19, %v1387_v58 }
 0x361   :  { %1142 = vst.msk [vmem:[#allocation5] sm:$0xff] %vm355_vm2, %v1140_v6  ;;  %v1141_v55 = vmax.f32 %v1139_v9, %v1137_v8  ;;  %553 = vrot.lane.b32.xlu0 %v548_v44, %s2159_s13  ;;  %551 = vrot.lane.b32.xlu1 %v547_v34, %s2159_s13 }
 0x362   :  { %v1292_v56 = vld [vmem:[#allocation4] sm:$0xff] }
 0x363   :  { %1143 = vst.msk [vmem:[#allocation5 + $0x8] sm:$0xff] %vm355_vm2, %v1141_v55 }
 0x368   :  { %v1242_v40 = vld [vmem:[#allocation5] sm:$0xff] }
 0x369   :  { %v1246_v14 = vadd.f32 %v1244_v45, %v1242_v40 }
 0x36a   :  { %v1243_v48 = vld [vmem:[#allocation5 + $0x8] sm:$0xff] }
 0x36b   :  { %v1247_v10 = vadd.f32 %v1245_v41, %v1243_v48  ;;  %v1281_v43 = vadd.f32 %v1274_v36, %v1246_v14 }
 0x36d   :  { %v1282_v18 = vadd.f32 %v1278_v13, %v1247_v10  ;;  %v1290_v52 = vadd.f32 %v1545_v42, %v1281_v43 }
 0x36f   :  { %v1291_v16 = vadd.f32 %v1545_v42, %v1282_v18  ;;  %1662 = vmatprep.mubr.msk.f32.mxu1 %vm355_vm2, %v1290_v52 }
 0x371   :  { %1663 = vmatmul.mubr.msk.f32.vlgmr.msra.gmra.mrb[4].mxu1 %vm355_vm2, %v1291_v16 }
 0x372   :  { %1703 = vmatpush3.bf16.msra.mxu1 %v1700_v17 }
 0x373   :  { %1705 = vmatprep.subr.bf16.mxu1 %v1704_v35 }
 0x376   :  { %1707 = vmatpush3.bf16.msra.mxu1 %v1704_v35 }
 0x3d3   :  { %v554_v26 = vpop.permute.xlu0 %553  ;;  %v552_v53 = vpop.permute.xlu1 %551 }
 0x3d4   :  { %559 = vst.msk [vmem:[#allocation30 + $0x8] sm:$0xff] %vm557_vm4, %v554_v26  ;;  %558 = vst.msk [vmem:[#allocation30] sm:$0xff] %vm557_vm4, %v552_v53 }
 0x444   :  { %v1664_v47 = vpop.f32.mrb[4].mxu1 }
 0x445   :  { %v1380_v54 = vadd.f32 %v1664_v47, %v1293_v50  ;;  %v1370_v57 = vpop.f32.mrb[5].mxu1 }
 0x446   :  { %v1379_v21 = vadd.f32 %v1370_v57, %v1292_v56 }
 0x447   :  { %v1382_v39 = vmax.f32 %v1380_v54, 0.0 }
 0x448   :  { %v1381_v59 = vmax.f32 %v1379_v21, 0.0 }
 0x449   :  { %1476 = vst.msk [vmem:[#allocation31 + $0x8] sm:$0xff] %vm355_vm2, %v1382_v39 }
 0x44a   :  { %1475 = vst.msk [vmem:[#allocation31] sm:$0xff] %vm355_vm2, %v1381_v59  ;;  %1673 = vmatprep.mubr.msk.f32.mxu1 %vm355_vm2, %v1381_v59 }
 0x44b   :  { %1674 = vmatmul.mubr.msk.f32.vlgmr.msra.gmra.mrb[6].mxu1 %vm355_vm2, %v1382_v39 }
 0x44c   :  { %2081 = shalt.err (!%p2078_p12)
}
 0x44d   :  { %s2082_s2 = scalar_lea.hbm %s2755_s16, 256 }
 0x44e   :  { %p2083_p13 = scmp.ne.s32.totalorder %s2755_s16, %s2082_s2  ;;  %p2086_p0 = scmp.lt.u32.totalorder %s2082_s2, %s2755_s16 }
 0x450   :  { %p2088_p1 = pnand %p2086_p0, %p2083_p13 }
 0x452   :  { %2091 = shalt.err (!%p2088_p1)
}
 0x453   :  { %1500 = dma.vmem_to_hbm [thread:$0]  %s1495_s29, 256, %s2755_s16, [#allocation32], %s2136_s18, %s2136_s18, %s2137_s19   ;;  %v1384_v38 = vld [vmem:[#allocation30 + $0x8] sm:$0xff]  ;;  %v1383_v61 = vld [vmem:[#allocation30] sm:$0xff] }
 0x454   :  { %s2161_s28 = smov [#allocation30]  }
 0x455   :  { %s1482_s22 = sshll.u32 %s2161_s28, 4  ;;  %s1483_s22 = int_to_ptr.vmem [resolvable:$true] %s1482_s22 }
 0x456   :  { %s2092_s17 = scalar_lea.vmem %s1483_s22, 256  ;;  %p2097_p3 = scmp.lt.s32.totalorder %s1483_s22, %s1483_s22 }
 0x457   :  { %p2093_p2 = scmp.ne.s32.totalorder %s1483_s22, %s2092_s17  ;;  %p2098_p4 = scmp.lt.s32.totalorder %s2092_s17, %s2092_s17 }
 0x459   :  { %p2099_p5 = por %p2098_p4, %p2097_p3 }
 0x45b   :  { %p2100_p6 = pnand %p2099_p5, %p2093_p2 }
 0x51e   :  { %v1675_v60 = vpop.f32.mrb[6].mxu1 }
 0x51f   :  { %v1471_v22 = vadd.f32 %v1675_v60, %v1384_v38  ;;  %v1461_v62 = vpop.f32.mrb[7].mxu1 }
 0x520   :  { %v1470_v1 = vadd.f32 %v1461_v62, %v1383_v61 }
 0x521   :  { %1474 = vst.msk [vmem:[#allocation30 + $0x8] sm:$0xff] %vm557_vm4, %v1471_v22 }
 0x522   :  { %1473 = vst.msk [vmem:[#allocation30] sm:$0xff] %vm557_vm4, %v1470_v1 }
 0x523   :  { %2103 = shalt.err (!%p2100_p6)
}
 0x524   :  { %s2104_s21 = scalar_lea.hbm %s2754_s15, 256 }
 0x525   :  { %p2105_p7 = scmp.ne.s32.totalorder %s2754_s15, %s2104_s21  ;;  %p2108_p8 = scmp.lt.u32.totalorder %s2104_s21, %s2754_s15 }
 0x527   :  { %p2110_p9 = pnand %p2108_p8, %p2105_p7 }
 0x529   :  { %2113 = shalt.err (!%p2110_p9)
}
 0x52a   :  { %1488 = dma.vmem_to_hbm [thread:$0]  %s1483_s22, 256, %s2754_s15, [#allocation8], %s2136_s18, %s2136_s18, %s2137_s19  }
 0x52b   :  { %2130 = dma.done.wait [#allocation8], 256  }
 0x52c   :  { %2131 = vsyncadd [#allocation8], 4294967040 }
 0x52d   :  { %2132 = dma.done.wait [#allocation32], 256  }
 0x52e   :  { %2133 = vsyncadd [#allocation32], 4294967040 }
 0x52f   :  { %1507 = vsyncpa [#allocation7], 1 }
 0x530   :  { %1508 = vsyncpa [#allocation10], 1 }
 0x531   :  { %1509 = vsyncpa [#allocation13], 1 }
 0x532   :  { %1510 = vsyncpa [#allocation16], 1 }
 0x533   :  { %1511 = vsyncpa [#allocation19], 1 }
 0x534   :  { %1512 = vsyncpa [#allocation22], 1 }
 0x535   :  { %1513 = vsyncpa [#allocation25], 1 }
 0x536   :  { %1514 = vsyncpa [#allocation28], 1 }
 0x537   :  { %1515 = vsyncpa [#allocation8], 1 }
 0x538   :  { %1516 = vsyncpa [#allocation32], 1 }

</bundles_post_ra>
